<compile_context>
chip_gen: v7x
topology: tpu7x:2x2x1
jax: 0.10.0
libtpu: 0.0.40
codegen_flags: <defaults>
</compile_context>

<pallas_src>
import jax
import jax.numpy as jnp
import numpy as np
from jax import lax
from jax.experimental import pallas as pl
from jax.experimental.pallas import tpu as pltpu

KERNEL_SIZE = 7            # module default
K = KERNEL_SIZE + 1        # actual conv kernel size = 8
PAD = KERNEL_SIZE // 2     # 3
LANE = 128                 # vreg lane width
SUB = 8                    # vreg sublane count (f32)
ACC_ROWS = 64              # output rows per accumulation block (MXU-friendly M)


def _round_up(x, m):
    return ((x + m - 1) // m) * m


def spatial_attention_kernel(x_ref, band_ref, b_ref, o_ref, scr_ref):
    """One channel-chunk reduction step; banded-matmul conv + sigmoid at the end.

    x_ref   : (CC, H, W)       f32 VMEM  channel chunk of the raw input
    band_ref: (K, 2*WL, WL)    f32 VMEM  per-kh band matrices (kw taps, both maps)
    b_ref   : (1,)             f32 SMEM  conv bias
    o_ref   : (1, HOp, WL)     f32 VMEM  lane-dense output slab (wrapper crops)
    scr_ref : (HS, 2*WL)       f32 VMEM  running channel max | channel sum
    """
    c = pl.program_id(0)
    nc = pl.num_programs(0)
    _, H, W = x_ref.shape
    HS, W2 = scr_ref.shape
    WL = W2 // 2
    HOp = o_ref.shape[1]

    # ---- init running reductions (first channel chunk) ----------------------
    @pl.when(c == 0)
    def _init():
        col = lax.broadcasted_iota(jnp.int32, (HS, W2), 1)
        # max half starts at -inf, sum half at 0
        scr_ref[...] = jnp.where(col < WL, -jnp.inf, 0.0).astype(jnp.float32)

    # ---- accumulate this channel chunk (HBM-bound phase) --------------------
    xb = x_ref[...]                               # (CC, H, W)
    cmax = jnp.max(xb, axis=0)                    # (H, W)
    csum = jnp.sum(xb, axis=0)                    # (H, W)
    scr_ref[0:H, 0:W] = jnp.maximum(scr_ref[0:H, 0:W], cmax)
    scr_ref[0:H, WL:WL + W] = scr_ref[0:H, WL:WL + W] + csum

    # ---- finalize: zero-pad, shift to conv origin, MXU banded conv, sigmoid -
    @pl.when(c == nc - 1)
    def _finalize():
        row = lax.broadcasted_iota(jnp.int32, (HS, W2), 0)
        col = lax.broadcasted_iota(jnp.int32, (HS, W2), 1)
        # everything outside the written max region becomes the conv's zero
        # padding (the sum half is already zero outside its written region)
        keep = (col >= WL) | ((row < H) & (col < W))
        s = jnp.where(keep, scr_ref[...], 0.0)
        # shift each map to origin (PAD, PAD) within its lane-half; all
        # wrapped-around rows/lanes are zeros by construction
        s = pltpu.roll(s, PAD, axis=1)
        s = pltpu.roll(s, PAD, axis=0)
        scr_ref[...] = s

        bias = b_ref[0]
        for r0 in range(0, HOp, ACC_ROWS):        # bounded accumulator live range
            rb = min(ACC_ROWS, HOp - r0)
            acc = jnp.full((rb, WL), bias, dtype=jnp.float32)
            for kh in range(K):
                # (rb, 2*WL) row slab x (2*WL, WL) band of kw taps -> MXU
                slab = scr_ref[r0 + kh:r0 + kh + rb, :]
                acc = acc + jnp.dot(slab, band_ref[kh],
                                    preferred_element_type=jnp.float32)
            o_ref[0, r0:r0 + rb, :] = jax.nn.sigmoid(acc)


def _pick_c_chunk(C, H, W, vmem_budget_bytes=8 << 20):
    """Largest divisor of C whose double-buffered input block fits the budget."""
    best = 1
    for d in range(1, C + 1):
        if C % d == 0 and 2 * d * H * W * 4 <= vmem_budget_bytes:
            best = d
    return best


def _build_band(weight, C, WL, Wo):
    """Band matrices B[kh, j, c]: j=c+kw carries the max taps, j=WL+c+kw the
    mean taps (pre-scaled by 1/C), for valid output columns c < Wo."""
    wmax = weight.astype(jnp.float32)[0, 0]                     # (K, K)
    wavg = weight.astype(jnp.float32)[0, 1] / jnp.float32(C)    # (K, K)
    band = jnp.zeros((K, 2 * WL, WL), jnp.float32)
    kh_i, kw_i, c_i = np.meshgrid(np.arange(K), np.arange(K), np.arange(Wo),
                                  indexing="ij")
    band = band.at[kh_i, c_i + kw_i, c_i].set(wmax[kh_i, kw_i])
    band = band.at[kh_i, WL + c_i + kw_i, c_i].set(wavg[kh_i, kw_i])
    return band


def spatial_attention(x, weight, bias, *, c_chunk=None):
    """x: (C, H, W). weight: (1, 2, K, K). bias: (1,). Returns (1, H-1, W-1) f32."""
    C, H, W = x.shape
    Ho = H + 2 * PAD - K + 1              # = H - 1
    Wo = W + 2 * PAD - K + 1              # = W - 1
    HOp = _round_up(Ho, SUB)              # output rows (unmasked sublane slab)
    WL = _round_up(W + 2 * PAD, LANE)     # lane-dense width >= padded width
    HS = _round_up(HOp + K - 1, SUB)      # scratch rows cover every conv tap row

    if c_chunk is None:
        c_chunk = _pick_c_chunk(C, H, W)
    if C % c_chunk != 0:
        raise ValueError(f"c_chunk={c_chunk} must divide C={C}")
    grid = (C // c_chunk,)

    x = x.astype(jnp.float32)
    band = _build_band(weight, C, WL, Wo)
    b = bias.astype(jnp.float32).reshape(1)

    vmem_bytes = (2 * (c_chunk * H * W * 4)     # double-buffered input blocks
                  + K * 2 * WL * WL * 4         # band taps (constant block)
                  + HS * 2 * WL * 4             # reduced-map scratch
                  + 2 * HOp * WL * 4)           # output slab
    vmem_limit = min(64 << 20, max(8 << 20, 4 * vmem_bytes))

    out = pl.pallas_call(
        spatial_attention_kernel,
        out_shape=jax.ShapeDtypeStruct((1, HOp, WL), jnp.float32),
        grid=grid,
        in_specs=[
            pl.BlockSpec((c_chunk, H, W), lambda c: (c, 0, 0)),
            pl.BlockSpec((K, 2 * WL, WL), lambda c: (0, 0, 0)),
            pl.BlockSpec(memory_space=pltpu.MemorySpace.SMEM),
        ],
        out_specs=pl.BlockSpec((1, HOp, WL), lambda c: (0, 0, 0)),
        scratch_shapes=[
            pltpu.VMEM((HS, 2 * WL), jnp.float32),   # running max | running sum
        ],
        compiler_params=pltpu.CompilerParams(
            dimension_semantics=("arbitrary",),
            vmem_limit_bytes=vmem_limit,
        ),
    )(x, band, b)

    # crop the lane-dense slab to the true conv output size
    return out[:, :Ho, :Wo]


def reference(x, weight, bias):
    """Pure-JAX reference matching the PyTorch forward."""
    mx = jnp.max(x, axis=0, keepdims=True)
    mn = jnp.mean(x, axis=0, keepdims=True)
    r = jnp.concatenate([mx, mn], axis=0)[None]               # (1, 2, H, W)
    out = lax.conv_general_dilated(
        r, weight, window_strides=(1, 1),
        padding=[(PAD, PAD), (PAD, PAD)],
        dimension_numbers=("NCHW", "OIHW", "NCHW"),
        precision=lax.Precision.HIGHEST)
    out = out + bias[None, :, None, None]
    return jax.nn.sigmoid(out)[0]                             # (1, Ho, Wo)


if __name__ == "__main__":
    key = jax.random.PRNGKey(0)
    kx, kw_, kb = jax.random.split(key, 3)

    C, H, W = 4, 16, 16
    x = jax.random.normal(kx, (C, H, W), dtype=jnp.float32)

    # Deterministic init mimicking PyTorch Conv2d default (uniform +/- 1/sqrt(fan_in))
    fan_in = 2 * K * K
    bound = 1.0 / (fan_in ** 0.5)
    weight = jax.random.uniform(kw_, (1, 2, K, K), minval=-bound, maxval=bound,
                                dtype=jnp.float32)
    bias = jax.random.uniform(kb, (1,), minval=-bound, maxval=bound,
                              dtype=jnp.float32)

    ref = reference(x, weight, bias)

    # c_chunk=2 exercises the multi-step channel reduction (grid of 2);
    # the default picks a single chunk for this tiny C.
    for cc in (2, None):
        out = jax.block_until_ready(spatial_attention(x, weight, bias, c_chunk=cc))
        assert out.shape == (1, H - 1, W - 1), out.shape
        err = float(jnp.max(jnp.abs(out - ref)))
        # tolerance accounts for the MXU's bf16-pass f32 matmul decomposition;
        # sigmoid outputs live in (0, 1) so this is still a tight check.
        assert jnp.allclose(out, ref, atol=1e-3, rtol=1e-3), err

    print("KERNEL_OK")
</pallas_src>

<mosaic_0001>
module attributes {stable_mosaic.version = 11 : i64} {
  func.func @spatial_attention_kernel(%arg0: i32, %arg1: memref<2x16x16xf32, #tpu.memory_space<vmem>>, %arg2: memref<8x256x128xf32, #tpu.memory_space<vmem>>, %arg3: memref<1xf32, #tpu.memory_space<smem>>, %arg4: memref<1x16x128xf32, #tpu.memory_space<vmem>>, %arg5: memref<24x256xf32, #tpu.memory_space<vmem>>) attributes {dimension_semantics = [#tpu.dimension_semantics<arbitrary>], iteration_bounds = array<i64: 2>, scalar_prefetch = 0 : i64, scratch_operands = 1 : i64, tpu.core_type = #tpu.core_type<tc>, window_params = [{transform_indices = @transform_0, window_bounds = array<i64: 2, 16, 16>}, {pipeline_mode = #tpu.pipeline_mode<synchronous>, transform_indices = @transform_1, window_bounds = array<i64: 8, 256, 128>}, {transform_indices = @transform_2, window_bounds = array<i64: 1>}, {pipeline_mode = #tpu.pipeline_mode<synchronous>, transform_indices = @transform_3, window_bounds = array<i64: 1, 16, 128>}]} {
    %c0_i32 = arith.constant 0 : i32
    %0 = arith.cmpi eq, %arg0, %c0_i32 : i32
    %1 = arith.extui %0 : i1 to i32
    %c0_i32_0 = arith.constant 0 : i32
    %2 = arith.cmpi ne, %1, %c0_i32_0 : i32
    scf.if %2 {
      %15 = tpu.iota {dimensions = array<i32: 1>} : vector<24x256xi32>
      %c128_i32 = arith.constant 128 : i32
      %16 = vector.broadcast %c128_i32 : i32 to vector<24x256xi32>
      %17 = arith.cmpi slt, %15, %16 : vector<24x256xi32>
      %cst_12 = arith.constant 0xFF800000 : f32
      %cst_13 = arith.constant 0.000000e+00 : f32
      %18 = vector.broadcast %cst_12 : f32 to vector<24x256xf32>
      %19 = vector.broadcast %cst_13 : f32 to vector<24x256xf32>
      %20 = arith.select %17, %18, %19 : vector<24x256xi1>, vector<24x256xf32>
      %c0_14 = arith.constant 0 : index
      %c0_15 = arith.constant 0 : index
      %21 = vector.load %arg5[%c0_14, %c0_15] : memref<24x256xf32, #tpu.memory_space<vmem>>, vector<24x256xf32>
      tpu.vector_store %arg5[%c0_14, %c0_15], %20 {strides = array<i32>} : memref<24x256xf32, #tpu.memory_space<vmem>>, vector<24x256xf32>,
    } else {
    }
    %c0 = arith.constant 0 : index
    %c0_1 = arith.constant 0 : index
    %c0_2 = arith.constant 0 : index
    %3 = vector.load %arg1[%c0, %c0_1, %c0_2] : memref<2x16x16xf32, #tpu.memory_space<vmem>>, vector<2x16x16xf32>
    %cst = arith.constant dense<0xFF800000> : vector<16x16xf32>
    %4 = vector.multi_reduction <maximumf>, %3, %cst [0] : vector<2x16x16xf32> to vector<16x16xf32>
    %cst_3 = arith.constant dense<0.000000e+00> : vector<16x16xf32>
    %5 = vector.multi_reduction <add>, %3, %cst_3 [0] : vector<2x16x16xf32> to vector<16x16xf32>
    %c0_4 = arith.constant 0 : index
    %c0_5 = arith.constant 0 : index
    %6 = vector.load %arg5[%c0_4, %c0_5] : memref<24x256xf32, #tpu.memory_space<vmem>>, vector<16x16xf32>
    %7 = arith.maximumf %6, %4 : vector<16x16xf32>
    %c0_6 = arith.constant 0 : index
    %c0_7 = arith.constant 0 : index
    %8 = vector.load %arg5[%c0_6, %c0_7] : memref<24x256xf32, #tpu.memory_space<vmem>>, vector<16x16xf32>
    tpu.vector_store %arg5[%c0_6, %c0_7], %7 {strides = array<i32>} : memref<24x256xf32, #tpu.memory_space<vmem>>, vector<16x16xf32>,
    %c0_8 = arith.constant 0 : index
    %c128 = arith.constant 128 : index
    %9 = vector.load %arg5[%c0_8, %c128] : memref<24x256xf32, #tpu.memory_space<vmem>>, vector<16x16xf32>
    %10 = arith.addf %9, %5 : vector<16x16xf32>
    %c0_9 = arith.constant 0 : index
    %c128_10 = arith.constant 128 : index
    %11 = vector.load %arg5[%c0_9, %c128_10] : memref<24x256xf32, #tpu.memory_space<vmem>>, vector<16x16xf32>
    tpu.vector_store %arg5[%c0_9, %c128_10], %10 {strides = array<i32>} : memref<24x256xf32, #tpu.memory_space<vmem>>, vector<16x16xf32>,
    %c1_i32 = arith.constant 1 : i32
    %12 = arith.cmpi eq, %arg0, %c1_i32 : i32
    %13 = arith.extui %12 : i1 to i32
    %c0_i32_11 = arith.constant 0 : i32
    %14 = arith.cmpi ne, %13, %c0_i32_11 : i32
    scf.if %14 {
      %15 = tpu.iota {dimensions = array<i32: 0>} : vector<24x256xi32>
      %16 = tpu.iota {dimensions = array<i32: 1>} : vector<24x256xi32>
      %c128_i32 = arith.constant 128 : i32
      %17 = vector.broadcast %c128_i32 : i32 to vector<24x256xi32>
      %18 = arith.cmpi sge, %16, %17 : vector<24x256xi32>
      %c16_i32 = arith.constant 16 : i32
      %19 = vector.broadcast %c16_i32 : i32 to vector<24x256xi32>
      %20 = arith.cmpi slt, %15, %19 : vector<24x256xi32>
      %c16_i32_12 = arith.constant 16 : i32
      %21 = vector.broadcast %c16_i32_12 : i32 to vector<24x256xi32>
      %22 = arith.cmpi slt, %16, %21 : vector<24x256xi32>
      %23 = arith.andi %20, %22 : vector<24x256xi1>
      %24 = arith.ori %18, %23 : vector<24x256xi1>
      %c0_13 = arith.constant 0 : index
      %c0_14 = arith.constant 0 : index
      %25 = vector.load %arg5[%c0_13, %c0_14] : memref<24x256xf32, #tpu.memory_space<vmem>>, vector<24x256xf32>
      %cst_15 = arith.constant 0.000000e+00 : f32
      %26 = vector.broadcast %cst_15 : f32 to vector<24x256xf32>
      %27 = arith.select %24, %25, %26 : vector<24x256xi1>, vector<24x256xf32>
      %c3_i32 = arith.constant 3 : i32
      %28 = tpu.dynamic_rotate %27 by %c3_i32 dim 1 : vector<24x256xf32>, i32 -> vector<24x256xf32>
      %c3_i32_16 = arith.constant 3 : i32
      %29 = tpu.dynamic_rotate %28 by %c3_i32_16 dim 0 : vector<24x256xf32>, i32 -> vector<24x256xf32>
      %c0_17 = arith.constant 0 : index
      %c0_18 = arith.constant 0 : index
      %30 = vector.load %arg5[%c0_17, %c0_18] : memref<24x256xf32, #tpu.memory_space<vmem>>, vector<24x256xf32>
      tpu.vector_store %arg5[%c0_17, %c0_18], %29 {strides = array<i32>} : memref<24x256xf32, #tpu.memory_space<vmem>>, vector<24x256xf32>,
      %c0_19 = arith.constant 0 : index
      %31 = memref.load %arg3[%c0_19] : memref<1xf32, #tpu.memory_space<smem>>
      %32 = vector.broadcast %31 : f32 to vector<16x128xf32>
      %c0_20 = arith.constant 0 : index
      %c0_21 = arith.constant 0 : index
      %33 = vector.load %arg5[%c0_20, %c0_21] : memref<24x256xf32, #tpu.memory_space<vmem>>, vector<16x256xf32>
      %c0_22 = arith.constant 0 : index
      %c0_23 = arith.constant 0 : index
      %c0_24 = arith.constant 0 : index
      %34 = vector.load %arg2[%c0_22, %c0_23, %c0_24] : memref<8x256x128xf32, #tpu.memory_space<vmem>>, vector<1x256x128xf32>
      %35 = vector.shape_cast %34 : vector<1x256x128xf32> to vector<256x128xf32>
      %cst_25 = arith.constant dense<0.000000e+00> : vector<16x128xf32>
      %36 = tpu.matmul %33, %35, %cst_25 {dimension_numbers = #tpu.dot_dimension_numbers<[1], [0], [0], [1], [0, 0, 1, 1], [], []>} : vector<16x256xf32>, vector<256x128xf32>, vector<16x128xf32> -> vector<16x128xf32>
      %37 = arith.addf %32, %36 : vector<16x128xf32>
      %c1 = arith.constant 1 : index
      %c0_26 = arith.constant 0 : index
      %38 = vector.load %arg5[%c1, %c0_26] : memref<24x256xf32, #tpu.memory_space<vmem>>, vector<16x256xf32>
      %c1_27 = arith.constant 1 : index
      %c0_28 = arith.constant 0 : index
      %c0_29 = arith.constant 0 : index
      %39 = vector.load %arg2[%c1_27, %c0_28, %c0_29] : memref<8x256x128xf32, #tpu.memory_space<vmem>>, vector<1x256x128xf32>
      %40 = vector.shape_cast %39 : vector<1x256x128xf32> to vector<256x128xf32>
      %cst_30 = arith.constant dense<0.000000e+00> : vector<16x128xf32>
      %41 = tpu.matmul %38, %40, %cst_30 {dimension_numbers = #tpu.dot_dimension_numbers<[1], [0], [0], [1], [0, 0, 1, 1], [], []>} : vector<16x256xf32>, vector<256x128xf32>, vector<16x128xf32> -> vector<16x128xf32>
      %42 = arith.addf %37, %41 : vector<16x128xf32>
      %c2 = arith.constant 2 : index
      %c0_31 = arith.constant 0 : index
      %43 = vector.load %arg5[%c2, %c0_31] : memref<24x256xf32, #tpu.memory_space<vmem>>, vector<16x256xf32>
      %c2_32 = arith.constant 2 : index
      %c0_33 = arith.constant 0 : index
      %c0_34 = arith.constant 0 : index
      %44 = vector.load %arg2[%c2_32, %c0_33, %c0_34] : memref<8x256x128xf32, #tpu.memory_space<vmem>>, vector<1x256x128xf32>
      %45 = vector.shape_cast %44 : vector<1x256x128xf32> to vector<256x128xf32>
      %cst_35 = arith.constant dense<0.000000e+00> : vector<16x128xf32>
      %46 = tpu.matmul %43, %45, %cst_35 {dimension_numbers = #tpu.dot_dimension_numbers<[1], [0], [0], [1], [0, 0, 1, 1], [], []>} : vector<16x256xf32>, vector<256x128xf32>, vector<16x128xf32> -> vector<16x128xf32>
      %47 = arith.addf %42, %46 : vector<16x128xf32>
      %c3 = arith.constant 3 : index
      %c0_36 = arith.constant 0 : index
      %48 = vector.load %arg5[%c3, %c0_36] : memref<24x256xf32, #tpu.memory_space<vmem>>, vector<16x256xf32>
      %c3_37 = arith.constant 3 : index
      %c0_38 = arith.constant 0 : index
      %c0_39 = arith.constant 0 : index
      %49 = vector.load %arg2[%c3_37, %c0_38, %c0_39] : memref<8x256x128xf32, #tpu.memory_space<vmem>>, vector<1x256x128xf32>
      %50 = vector.shape_cast %49 : vector<1x256x128xf32> to vector<256x128xf32>
      %cst_40 = arith.constant dense<0.000000e+00> : vector<16x128xf32>
      %51 = tpu.matmul %48, %50, %cst_40 {dimension_numbers = #tpu.dot_dimension_numbers<[1], [0], [0], [1], [0, 0, 1, 1], [], []>} : vector<16x256xf32>, vector<256x128xf32>, vector<16x128xf32> -> vector<16x128xf32>
      %52 = arith.addf %47, %51 : vector<16x128xf32>
      %c4 = arith.constant 4 : index
      %c0_41 = arith.constant 0 : index
      %53 = vector.load %arg5[%c4, %c0_41] : memref<24x256xf32, #tpu.memory_space<vmem>>, vector<16x256xf32>
      %c4_42 = arith.constant 4 : index
      %c0_43 = arith.constant 0 : index
      %c0_44 = arith.constant 0 : index
      %54 = vector.load %arg2[%c4_42, %c0_43, %c0_44] : memref<8x256x128xf32, #tpu.memory_space<vmem>>, vector<1x256x128xf32>
      %55 = vector.shape_cast %54 : vector<1x256x128xf32> to vector<256x128xf32>
      %cst_45 = arith.constant dense<0.000000e+00> : vector<16x128xf32>
      %56 = tpu.matmul %53, %55, %cst_45 {dimension_numbers = #tpu.dot_dimension_numbers<[1], [0], [0], [1], [0, 0, 1, 1], [], []>} : vector<16x256xf32>, vector<256x128xf32>, vector<16x128xf32> -> vector<16x128xf32>
      %57 = arith.addf %52, %56 : vector<16x128xf32>
      %c5 = arith.constant 5 : index
      %c0_46 = arith.constant 0 : index
      %58 = vector.load %arg5[%c5, %c0_46] : memref<24x256xf32, #tpu.memory_space<vmem>>, vector<16x256xf32>
      %c5_47 = arith.constant 5 : index
      %c0_48 = arith.constant 0 : index
      %c0_49 = arith.constant 0 : index
      %59 = vector.load %arg2[%c5_47, %c0_48, %c0_49] : memref<8x256x128xf32, #tpu.memory_space<vmem>>, vector<1x256x128xf32>
      %60 = vector.shape_cast %59 : vector<1x256x128xf32> to vector<256x128xf32>
      %cst_50 = arith.constant dense<0.000000e+00> : vector<16x128xf32>
      %61 = tpu.matmul %58, %60, %cst_50 {dimension_numbers = #tpu.dot_dimension_numbers<[1], [0], [0], [1], [0, 0, 1, 1], [], []>} : vector<16x256xf32>, vector<256x128xf32>, vector<16x128xf32> -> vector<16x128xf32>
      %62 = arith.addf %57, %61 : vector<16x128xf32>
      %c6 = arith.constant 6 : index
      %c0_51 = arith.constant 0 : index
      %63 = vector.load %arg5[%c6, %c0_51] : memref<24x256xf32, #tpu.memory_space<vmem>>, vector<16x256xf32>
      %c6_52 = arith.constant 6 : index
      %c0_53 = arith.constant 0 : index
      %c0_54 = arith.constant 0 : index
      %64 = vector.load %arg2[%c6_52, %c0_53, %c0_54] : memref<8x256x128xf32, #tpu.memory_space<vmem>>, vector<1x256x128xf32>
      %65 = vector.shape_cast %64 : vector<1x256x128xf32> to vector<256x128xf32>
      %cst_55 = arith.constant dense<0.000000e+00> : vector<16x128xf32>
      %66 = tpu.matmul %63, %65, %cst_55 {dimension_numbers = #tpu.dot_dimension_numbers<[1], [0], [0], [1], [0, 0, 1, 1], [], []>} : vector<16x256xf32>, vector<256x128xf32>, vector<16x128xf32> -> vector<16x128xf32>
      %67 = arith.addf %62, %66 : vector<16x128xf32>
      %c7 = arith.constant 7 : index
      %c0_56 = arith.constant 0 : index
      %68 = vector.load %arg5[%c7, %c0_56] : memref<24x256xf32, #tpu.memory_space<vmem>>, vector<16x256xf32>
      %c7_57 = arith.constant 7 : index
      %c0_58 = arith.constant 0 : index
      %c0_59 = arith.constant 0 : index
      %69 = vector.load %arg2[%c7_57, %c0_58, %c0_59] : memref<8x256x128xf32, #tpu.memory_space<vmem>>, vector<1x256x128xf32>
      %70 = vector.shape_cast %69 : vector<1x256x128xf32> to vector<256x128xf32>
      %cst_60 = arith.constant dense<0.000000e+00> : vector<16x128xf32>
      %71 = tpu.matmul %68, %70, %cst_60 {dimension_numbers = #tpu.dot_dimension_numbers<[1], [0], [0], [1], [0, 0, 1, 1], [], []>} : vector<16x256xf32>, vector<256x128xf32>, vector<16x128xf32> -> vector<16x128xf32>
      %72 = arith.addf %67, %71 : vector<16x128xf32>
      %73 = arith.negf %72 : vector<16x128xf32>
      %74 = math.exp %73 : vector<16x128xf32>
      %cst_61 = arith.constant 1.000000e+00 : f32
      %75 = vector.broadcast %cst_61 : f32 to vector<16x128xf32>
      %76 = arith.addf %75, %74 : vector<16x128xf32>
      %77 = arith.divf %75, %76 : vector<16x128xf32>
      %c0_62 = arith.constant 0 : index
      %c0_63 = arith.constant 0 : index
      %c0_64 = arith.constant 0 : index
      %78 = vector.load %arg4[%c0_62, %c0_63, %c0_64] : memref<1x16x128xf32, #tpu.memory_space<vmem>>, vector<1x16x128xf32>
      %79 = vector.shape_cast %78 : vector<1x16x128xf32> to vector<16x128xf32>
      %80 = vector.shape_cast %77 : vector<16x128xf32> to vector<1x16x128xf32>
      tpu.vector_store %arg4[%c0_62, %c0_63, %c0_64], %80 {strides = array<i32>} : memref<1x16x128xf32, #tpu.memory_space<vmem>>, vector<1x16x128xf32>,
    } else {
    }
    return
  }
  func.func @transform_0(%arg0: i32) -> (i32, i32, i32) {
    %c0_i32 = arith.constant 0 : i32
    %c0_i32_0 = arith.constant 0 : i32
    %c0_i32_1 = arith.constant 0 : i32
    return %arg0, %c0_i32, %c0_i32_0 : i32, i32, i32
  }
  func.func @transform_1(%arg0: i32) -> (i32, i32, i32) {
    %c0_i32 = arith.constant 0 : i32
    %c0_i32_0 = arith.constant 0 : i32
    %c0_i32_1 = arith.constant 0 : i32
    %c0_i32_2 = arith.constant 0 : i32
    return %c0_i32, %c0_i32_0, %c0_i32_1 : i32, i32, i32
  }
  func.func @transform_2(%arg0: i32) -> i32 {
    %c0_i32 = arith.constant 0 : i32
    %c0_i32_0 = arith.constant 0 : i32
    return %c0_i32 : i32
  }
  func.func @transform_3(%arg0: i32) -> (i32, i32, i32) {
    %c0_i32 = arith.constant 0 : i32
    %c0_i32_0 = arith.constant 0 : i32
    %c0_i32_1 = arith.constant 0 : i32
    %c0_i32_2 = arith.constant 0 : i32
    return %c0_i32, %c0_i32_0, %c0_i32_1 : i32, i32, i32
  }
}

</mosaic_0001>

<bundles_post_ra>
// kernel: tpu_custom_call.1
= control target key start
LH: loop header
LB: loop body
LE: loop exit
PB: predicated region body
PF: predicated region fallthrough
CT: control target
= control target key end

     0   :  { %s2560_s0 = inlined_call_operand.hbm [shape: f32[4,16,16], index: 0, kind: input, shape index: {}]   ;;  %s2561_s1 = inlined_call_operand.hbm [shape: f32[8,256,128], index: 1, kind: input, shape index: {}]   ;;  %s2562_s2 = inlined_call_operand.<no memory space> [shape: f32[1], index: 2, kind: input, shape index: {}]   ;;  %s2563_s3 = inlined_call_operand.hbm [shape: f32[1,16,128], index: 3, kind: output, shape index: {}]  }
   0x1   :  { %8 = sst [smem:[#allocation3]] %s2562_s2 }
   0x2   :  { %9 = vsyncpa [#allocation5], 0 }
   0x3   :  { %11 = vsyncpa [#allocation5 + $0x1], 0 }
   0x4   :  { %12 = vsyncpa [#allocation8], 0 }
   0x5   :  { %13 = vsyncpa [#allocation6], 0  ;;  %s2270_s14 = smov 0   ;;  %s2272_s15 = smov 0  }
   0x6   :  { %s2274_s16 = smov 0   ;;  %s2276_s17 = smov 0  }
   0x7 LB: > { %s2289_s2 = sadd.s32 4294967295, %s2234_s17   ;;  %p39_p0 = scmp.ne.s32.totalorder %s2226_s15, %s2222_s14  ;;  %s2234_s17 = sphi %s2276_s17, %s2579_s17   ;;  %s2230_s16 = sphi %s2274_s16, %s2578_s16   ;;  %s2226_s15 = sphi %s2272_s15, %s2577_s15   ;;  %s2222_s14 = sphi %s2270_s14, %s2576_s14  }
   0x8   : > { %p2564_p1 = scmp.eq.s32.totalorder %s2289_s2, 0  ;;  %p1455_p2 = scmp.ge.s32.totalorder %s2234_s17, 1 }
   0x9   : > { %p113_p3 = scmp.lt.s32.totalorder %s2234_s17, 3  ;;  %s2236_s20 = smov [#allocation7]  }
   0xa   : > { %p2298_p5 = por %p2564_p1, %p39_p0  ;;  %s125_s21 = sshll.u32 %s2236_s20, 4  ;;  %s126_s21 = int_to_ptr.vmem [resolvable:$true] %s125_s21 }
   0xb   : > { %p2302_p6 = pnand %p1455_p2, %p113_p3  ;;  %s2315_s23 = sadd.s32 1, %s2234_s17  }
   0xc   : > { %s2567_s18 = scalar_select %p2298_p5, 1, 0 }
   0xd   : > { %s2568_s19 = scalar_select %p2302_p6, 1, 0 }
   0xe   : > { %p2045_p7 = pneg %p2302_p6  ;;  %s26_s24 = sadd.s32 1, %s2230_s16 }
   0xf   : > { %s23_s25 = ssub.s32 %s2234_s17, %s2315_s23  ;;  %s2108_s28 = scalar_lea.hbm %s2561_s1, 32768 }
  0x10   : > { %p2310_p8 = pnand %p2045_p7, %p2564_p1  ;;  %p2109_p9 = scmp.ne.s32.totalorder %s2561_s1, %s2108_s28 }
  0x11   : > { %p2115_p13 = scmp.lt.u32.totalorder %s2108_s28, %s2561_s1 }
  0x12   : > { %p2110_p10 = pneg %p2310_p8 }
  0x14   : > { %p2111_p11 = pnand %p2110_p10, %p2109_p9 }
  0x16   : > { %p2112_p12 = pneg %p2111_p11 }
  0x18   : > { %p2117_p0 = pnand %p2115_p13, %p2112_p12 }
  0x1a   : > { %2120 = shalt.err (!%p2117_p0)
}
  0x1b   : > { %s2121_s6 = scalar_lea.vmem %s126_s21, 32768  ;;  %p2129_p4 = scmp.lt.s32.totalorder %s126_s21, %s126_s21 }
  0x1c   : > { %p2122_p2 = scmp.ne.s32.totalorder %s126_s21, %s2121_s6  ;;  %p2130_p1 = scmp.lt.s32.totalorder %s2121_s6, %s2121_s6 }
  0x1e   : > { %p2124_p3 = pnand %p2122_p2, %p2110_p10  ;;  %p2131_p5 = por %p2130_p1, %p2129_p4 }
  0x20   : > { %p2125_p7 = pneg %p2124_p3 }
  0x22   : > { %p2132_p6 = pnand %p2131_p5, %p2125_p7 }
  0x24   : > { %2135 = shalt.err (!%p2132_p6)
}
  0x25   : > { %s2237_s7 = smov 128   ;;  %s2238_s8 = smov 8  }
  0x26   : > { %2048 = dma.hbm_to_vmem [thread:$0]  (!%p2310_p8), %s2561_s1, 32768, %s126_s21, [#allocation8], %s2237_s7, %s2237_s7, %s2238_s8  }
  0x27   : > { %p24_p1 = scmp.eq.s32.totalorder %s23_s25, 0  ;;  %p33_p4 = scmp.ne.s32.totalorder %s2230_s16, %s2226_s15 }
  0x28   : > { %p34_p5 = scmp.eq.s32.totalorder %s2234_s17, 0  ;;  %p2054_p6 = scmp.lt.s32.totalorder %s2234_s17, 2 }
  0x29   : > { %s2344_s11 = scalar_select %p24_p1, %s2230_s16, %s26_s24  }
  0x2a   : > { %p35_p9 = por %p34_p5, %p33_p4  ;;  %s142_s12 = sand.u32 1, %s2230_s16  }
  0x2b   : > { %s1458_s13 = sshll.u32 %s142_s12, 5  ;;  %s1474_s14 = sshll.u32 %s2234_s17, 9 }
  0x2c   : > { %s2351_s22 = scalar_lea.hbm %s2560_s0, %s1474_s14  ;;  %s146_s21 = scalar_lea.vmem [#allocation4], %s1458_s13 }
  0x2d   : > { %s154_s25 = sshll.u32 %s146_s21, 4  ;;  %p2355_p8 = pnand %p2054_p6, %p35_p9  ;;  %s2353_s25 = int_to_ptr.vmem [resolvable:$true] %s154_s25 }
  0x2e   : > { %s2359_s17 = scalar_lea.sflag [#allocation5], %s142_s12  ;;  %s2136_s27 = scalar_lea.hbm %s2351_s22, 512 }
  0x2f   : > { %p2137_p10 = scmp.ne.s32.totalorder %s2351_s22, %s2136_s27  ;;  %p2138_p11 = pneg %p2355_p8 }
  0x30   : > { %s2141_s30 = scalar_lea.hbm %s2560_s0, 1024  ;;  %p2142_p0 = scmp.lt.u32.totalorder %s2351_s22, %s2560_s0 }
  0x31   : > { %p2139_p12 = pnand %p2138_p11, %p2137_p10  ;;  %p2143_p2 = scmp.lt.u32.totalorder %s2141_s30, %s2136_s27 }
  0x32   : > { %p2145_p7 = scmp.lt.u32.totalorder %s2136_s27, %s2351_s22 }
  0x33   : > { %p2140_p13 = pneg %p2139_p12  ;;  %p2144_p3 = por %p2143_p2, %p2142_p0 }
  0x35   : > { %p2146_p1 = por %p2145_p7, %p2144_p3 }
  0x37   : > { %p2147_p4 = pnand %p2146_p1, %p2140_p13 }
  0x39   : > { %2150 = shalt.err (!%p2147_p4)
}
  0x3a   : > { %s2151_s6 = scalar_lea.vmem %s2353_s25, 512  ;;  %s2239_s9 = smov [#allocation4]  }
  0x3b   : > { %p2152_p5 = scmp.ne.s32.totalorder %s2353_s25, %s2151_s6  ;;  %s2156_s10 = sshll.u32 %s2239_s9, 4  ;;  %s2157_s10 = int_to_ptr.vmem [resolvable:$false] %s2156_s10 }
  0x3c   : > { %s2158_s12 = scalar_lea.vmem %s2157_s10, 1024  ;;  %p2159_p10 = scmp.lt.s32.totalorder %s2353_s25, %s2157_s10 }
  0x3d   : > { %p2154_p6 = pnand %p2152_p5, %p2138_p11  ;;  %p2160_p12 = scmp.lt.s32.totalorder %s2158_s12, %s2151_s6 }
  0x3f   : > { %p2155_p9 = pneg %p2154_p6  ;;  %p2161_p0 = por %p2160_p12, %p2159_p10 }
  0x41   : > { %p2162_p2 = pnand %p2161_p0, %p2155_p9 }
  0x43   : > { %2165 = shalt.err (!%p2162_p2)
}
  0x44   : > { %2052 = dma.hbm_to_vmem [thread:$0]  (!%p2355_p8), %s2351_s22, 512, %s2353_s25, %s2359_s17, %s2237_s7, %s2237_s7, %s2238_s8  }
  0x45   : > { %p2571_p11 = scmp.ne.s32.totalorder %s2568_s19, 0 }
  0x46   : > { %s168_s13 = sand.u32 (!%p2571_p11), 1, %s2226_s15   ;;  %p2572_p13 = scmp.ne.s32.totalorder (!%p2571_p11), %s2567_s18, 0 }
  0x47   : > { %166 = sbr.rel (%p2571_p11) target bundleno = 612 (0x264), region = 32  ;;  %s1463_s14 = sshll.u32 (!%p2571_p11), %s168_s13, 5 }
  0x48   : > { %s169_s20 = scalar_lea.sflag (!%p2571_p11), [#allocation5], %s168_s13  ;;  %s172_s26 = scalar_lea.vmem (!%p2571_p11), [#allocation4], %s1463_s14 }
  0x4e   : > { %2209 = dma.done.wait (%p2572_p13), %s169_s20, 512  }
  0x4f   : > { %2211 = vsyncadd (%p2572_p13), %s169_s20, 4294966784  ;;  %p2573_p3 = scmp.eq.s32.totalorder %s2289_s2, 0 }
  0x51   : > { %2213 = dma.done.wait (%p2573_p3), [#allocation8], 32768   ;;  %p2574_p7 = pmov %p2573_p3 }
  0x52   : > { %p2575_p8 = scmp.ne.s32.totalorder %s2289_s2, 0 }
  0x53   : > { %2215 = vsyncadd (%p2574_p7), [#allocation8], 4294934528  ;;  %v2240_v0 = vmov (!%p2575_p8), -inf   ;;  %v2241_v1 = vmov (!%p2575_p8), 0.0  }
  0x54   : > { %198 = sbr.rel (%p2575_p8) target bundleno = 91 (0x5b), region = 44  ;;  %206 = vst [vmem:[#allocation2] sm:$0xff] (!%p2575_p8), %v2240_v0  ;;  %208 = vst [vmem:[#allocation2 + $0x10] sm:$0xff] (!%p2575_p8), %v2240_v0 }
  0x55   : > { %210 = vst [vmem:[#allocation2 + $0x20] sm:$0xff] (!%p2575_p8), %v2240_v0  ;;  %207 = vst [vmem:[#allocation2 + $0x8] sm:$0xff] (!%p2575_p8), %v2241_v1 }
  0x56   : > { %209 = vst [vmem:[#allocation2 + $0x18] sm:$0xff] (!%p2575_p8), %v2241_v1  ;;  %211 = vst [vmem:[#allocation2 + $0x28] sm:$0xff] (!%p2575_p8), %v2241_v1 }
  0x5b PF: > { %v212_v2 = vld [vmem:[%s172_s26] sm:$0xff]  ;;  %v214_v3 = vld [vmem:[%s172_s26 + $0x10] sm:$0xff]  ;;  %vm216_vm0 = vcmask 130048   ;;  %v213_v7 = vld [vmem:[%s172_s26 + $0x8] sm:$0xff]  ;;  %p1466_p1 = scmp.ne.s32.totalorder %s2289_s2, 1 }
  0x5c   : > { %v217_v4 = vsel %vm216_vm0, %v212_v2, -inf  ;;  %v218_v5 = vsel %vm216_vm0, %v214_v3, -inf  ;;  %v229_v6 = vld [vmem:[#allocation2] sm:$0xff]  ;;  %v215_v8 = vld [vmem:[%s172_s26 + $0x18] sm:$0xff]  ;;  %v223_v9 = vsel %vm216_vm0, %v212_v2, 0.0  ;;  %v220_v11 = vsel %vm216_vm0, %v213_v7, -inf }
  0x5d   : > { %v219_v10 = vmax.f32 %v217_v4, %v218_v5  ;;  %v221_v12 = vsel %vm216_vm0, %v215_v8, -inf  ;;  %v230_v13 = vld [vmem:[#allocation2 + $0x10] sm:$0xff]  ;;  %v224_v14 = vsel %vm216_vm0, %v214_v3, 0.0  ;;  %v235_v15 = vld [vmem:[#allocation2 + $0x8] sm:$0xff]  ;;  %v226_v18 = vsel %vm216_vm0, %v213_v7, 0.0  ;;  %v236_v20 = vld [vmem:[#allocation2 + $0x18] sm:$0xff] }
  0x5e   : > { %v222_v16 = vmax.f32 %v220_v11, %v221_v12  ;;  %v225_v17 = vadd.f32 %v224_v14, %v223_v9  ;;  %v227_v19 = vsel %vm216_vm0, %v215_v8, 0.0  ;;  %244 = sbr.rel (%p1466_p1) target bundleno = 586 (0x24a), region = 48  ;;  %v245_v26 = vlaneseq (!%p1466_p1)  ;;  %s2243_s18 = smov (!%p1466_p1), 3   ;;  %v343_v30 = vld [vmem:[#allocation7 + $0x80] sm:$0xff] (!%p1466_p1)  ;;  %v344_v33 = vld [vmem:[#allocation7 + $0x88] sm:$0xff] (!%p1466_p1)  ;;  %v345_v38 = vld [vmem:[#allocation7 + $0x90] sm:$0xff] (!%p1466_p1) }
  0x5f   : > { %v231_v21 = vmax.f32 %v229_v6, %v219_v10  ;;  %v228_v22 = vadd.f32 %v227_v19, %v226_v18  ;;  %v2242_v27 = vmov (!%p1466_p1), 0.0   ;;  %v327_v34 = vld [vmem:[#allocation7] sm:$0xff] (!%p1466_p1)  ;;  %v328_v35 = vld [vmem:[#allocation7 + $0x8] sm:$0xff] (!%p1466_p1)  ;;  %v1779_v36 = vpack.c.bf16 (!%p1466_p1), %v344_v33, %v343_v30  ;;  %v346_v39 = vld [vmem:[#allocation7 + $0x98] sm:$0xff] (!%p1466_p1)  ;;  %s321_s19 = sld [smem:[#allocation3]] (!%p1466_p1) }
  0x60   : > { %v232_v23 = vmax.f32 %v230_v13, %v222_v16  ;;  %v237_v24 = vadd.f32 %v235_v15, %v225_v17  ;;  %287 = vrot.lane.b32.xlu1 (!%p1466_p1), %v2242_v27, %s2243_s18  ;;  %v2418_v31 = vand.u32 (!%p1466_p1), 127, %v245_v26  ;;  %v1781_v37 = vpack.c.bf16 (!%p1466_p1), %v328_v35, %v327_v34  ;;  %v329_v40 = vld [vmem:[#allocation7 + $0x10] sm:$0xff] (!%p1466_p1)  ;;  %v330_v42 = vld [vmem:[#allocation7 + $0x18] sm:$0xff] (!%p1466_p1)  ;;  %v347_v43 = vld [vmem:[#allocation7 + $0xa0] sm:$0xff] (!%p1466_p1) }
  0x61   : > { %233 = vst.msk [vmem:[#allocation2] sm:$0xff] %vm216_vm0, %v231_v21  ;;  %v238_v25 = vadd.f32 %v236_v20, %v228_v22  ;;  %v1783_v41 = vpack.c.bf16 (!%p1466_p1), %v346_v39, %v345_v38  ;;  %v348_v44 = vld [vmem:[#allocation7 + $0xa8] sm:$0xff] (!%p1466_p1)  ;;  %1780 = vmatprep.subr.bf16.mxu0 (!%p1466_p1), %v1779_v36  ;;  %v459_v46 = vld [vmem:[#allocation7 + $0x180] sm:$0xff] (!%p1466_p1)  ;;  %v276_v48 = vld [vmem:[#allocation2 + $0x28] sm:$0xff] (!%p1466_p1)  ;;  %v1785_v49 = vpack.c.bf16 (!%p1466_p1), %v330_v42, %v329_v40  ;;  %vm481_vm4 = vcmask (!%p1466_p1), 1046528  }
  0x62   : > { %234 = vst.msk [vmem:[#allocation2 + $0x10] sm:$0xff] %vm216_vm0, %v232_v23  ;;  %239 = vst.msk [vmem:[#allocation2 + $0x8] sm:$0xff] %vm216_vm0, %v237_v24  ;;  %vm257_vm1 = vcmp.lt.s32.totalorder (!%p1466_p1), %v2418_v31, 16  ;;  %v460_v47 = vld [vmem:[#allocation7 + $0x188] sm:$0xff] (!%p1466_p1)  ;;  %1782 = vmatpush3.bf16.msra.mxu0 (!%p1466_p1), %v1781_v37  ;;  %v443_v51 = vld [vmem:[#allocation7 + $0x100] sm:$0xff] (!%p1466_p1)  ;;  %v1787_v54 = vpack.c.bf16 (!%p1466_p1), %v348_v44, %v347_v43  ;;  %vm295_vm2 = vcmp.lt.s32.totalorder (!%p1466_p1), %v2418_v31, 3 }
  0x63   : > { %240 = vst.msk [vmem:[#allocation2 + $0x18] sm:$0xff] %vm216_vm0, %v238_v25  ;;  %v1811_v50 = vpack.c.bf16 (!%p1466_p1), %v460_v47, %v459_v46  ;;  %v444_v52 = vld [vmem:[#allocation7 + $0x108] sm:$0xff] (!%p1466_p1)  ;;  %1784 = vmatprep.subr.bf16.mxu0 (!%p1466_p1), %v1783_v41  ;;  %v331_v55 = vld [vmem:[#allocation7 + $0x20] sm:$0xff] (!%p1466_p1)  ;;  %v461_v58 = vld [vmem:[#allocation7 + $0x190] sm:$0xff] (!%p1466_p1)  ;;  %vm614_vm5 = vcmask (!%p1466_p1), 1045504   ;;  %vm747_vm6 = vcmask (!%p1466_p1), 1044480  }
  0x64   : > { %v332_v56 = vld [vmem:[#allocation7 + $0x28] sm:$0xff] (!%p1466_p1)  ;;  %v1813_v57 = vpack.c.bf16 (!%p1466_p1), %v444_v52, %v443_v51  ;;  %v349_v59 = vld [vmem:[#allocation7 + $0xb0] sm:$0xff] (!%p1466_p1)  ;;  %v350_v60 = vld [vmem:[#allocation7 + $0xb8] sm:$0xff] (!%p1466_p1)  ;;  %vm880_vm7 = vcmask (!%p1466_p1), 1043456   ;;  %vm1013_vm8 = vcmask (!%p1466_p1), 1042432   ;;  %vm1146_vm9 = vcmask (!%p1466_p1), 1041408  }
  0x65   : > { %1812 = vmatprep.subr.bf16.mxu1 %v1811_v50  ;;  %v462_v61 = vld [vmem:[#allocation7 + $0x198] sm:$0xff]  ;;  %v445_v63 = vld [vmem:[#allocation7 + $0x110] sm:$0xff]  ;;  %v1789_v2 = vpack.c.bf16 %v332_v56, %v331_v55  ;;  %v463_v4 = vld [vmem:[#allocation7 + $0x1a0] sm:$0xff]  ;;  %v1791_v6 = vpack.c.bf16 %v350_v60, %v349_v59  ;;  %vm1279_vm10 = vcmask 1040384  }
  0x66   : > { %1814 = vmatpush3.bf16.msra.mxu1 %v1813_v57  ;;  %v1815_v62 = vpack.c.bf16 %v462_v61, %v461_v58  ;;  %v446_v0 = vld [vmem:[#allocation7 + $0x118] sm:$0xff]  ;;  %1786 = vmatpush3.bf16.msra.mxu0 %v1785_v49  ;;  %v464_v5 = vld [vmem:[#allocation7 + $0x1a8] sm:$0xff]  ;;  %v333_v7 = vld [vmem:[#allocation7 + $0x30] sm:$0xff] }
  0x67   : > { %v1817_v3 = vpack.c.bf16 %v446_v0, %v445_v63  ;;  %1788 = vmatprep.subr.bf16.mxu0 %v1787_v54  ;;  %v334_v8 = vld [vmem:[#allocation7 + $0x38] sm:$0xff]  ;;  %v1819_v9 = vpack.c.bf16 %v464_v5, %v463_v4  ;;  %v447_v10 = vld [vmem:[#allocation7 + $0x120] sm:$0xff]  ;;  %v352_v12 = vld [vmem:[#allocation7 + $0xc8] sm:$0xff] }
  0x68   : > { %v271_v29 = vld [vmem:[#allocation2] sm:$0xff]  ;;  %1816 = vmatprep.subr.bf16.mxu1 %v1815_v62  ;;  %v351_v11 = vld [vmem:[#allocation7 + $0xc0] sm:$0xff]  ;;  %v448_v13 = vld [vmem:[#allocation7 + $0x128] sm:$0xff]  ;;  %v1793_v17 = vpack.c.bf16 %v334_v8, %v333_v7 }
  0x69   : > { %v272_v28 = vld [vmem:[#allocation2 + $0x8] sm:$0xff]  ;;  %v273_v32 = vld [vmem:[#allocation2 + $0x10] sm:$0xff]  ;;  %v277_v45 = vsel %vm257_vm1, %v271_v29, 0.0  ;;  %v1821_v14 = vpack.c.bf16 %v448_v13, %v447_v10  ;;  %v465_v15 = vld [vmem:[#allocation7 + $0x1b0] sm:$0xff]  ;;  %v1795_v21 = vpack.c.bf16 %v352_v12, %v351_v11 }
  0x6a   : > { %289 = vrot.lane.b32.xlu1 %v272_v28, %s2243_s18  ;;  %283 = vrot.lane.b32.xlu0 %v277_v45, %s2243_s18  ;;  %v279_v53 = vsel %vm257_vm1, %v273_v32, 0.0  ;;  %v274_v1 = vld [vmem:[#allocation2 + $0x18] sm:$0xff]  ;;  %v466_v16 = vld [vmem:[#allocation7 + $0x1b8] sm:$0xff]  ;;  %v449_v19 = vld [vmem:[#allocation7 + $0x130] sm:$0xff] }
  0x6b   : > { %1818 = vmatpush3.bf16.msra.mxu1 %v1817_v3  ;;  %1790 = vmatpush3.bf16.msra.mxu0 %v1789_v2  ;;  %v1823_v18 = vpack.c.bf16 %v466_v16, %v465_v15  ;;  %v450_v20 = vld [vmem:[#allocation7 + $0x138] sm:$0xff]  ;;  %v335_v22 = vld [vmem:[#allocation7 + $0x40] sm:$0xff]  ;;  %v336_v23 = vld [vmem:[#allocation7 + $0x48] sm:$0xff] }
  0x6c   : > { %1792 = vmatprep.subr.bf16.mxu0 %v1791_v6  ;;  %1820 = vmatprep.subr.bf16.mxu1 %v1819_v9  ;;  %v467_v24 = vld [vmem:[#allocation7 + $0x1c0] sm:$0xff]  ;;  %v353_v25 = vld [vmem:[#allocation7 + $0xd0] sm:$0xff]  ;;  %v354_v27 = vld [vmem:[#allocation7 + $0xd8] sm:$0xff]  ;;  %v1825_v29 = vpack.c.bf16 %v450_v20, %v449_v19  ;;  %v1797_v30 = vpack.c.bf16 %v336_v23, %v335_v22 }
  0x6d   : > { %v468_v28 = vld [vmem:[#allocation7 + $0x1c8] sm:$0xff]  ;;  %v337_v32 = vld [vmem:[#allocation7 + $0x50] sm:$0xff]  ;;  %v451_v34 = vld [vmem:[#allocation7 + $0x140] sm:$0xff]  ;;  %v1799_v36 = vpack.c.bf16 %v354_v27, %v353_v25 }
  0x6e   : > { %293 = vrot.lane.b32.xlu1 %v276_v48, %s2243_s18  ;;  %285 = vrot.lane.b32.xlu0 %v279_v53, %s2243_s18  ;;  %v1827_v33 = vpack.c.bf16 %v468_v28, %v467_v24  ;;  %v452_v35 = vld [vmem:[#allocation7 + $0x148] sm:$0xff]  ;;  %v338_v37 = vld [vmem:[#allocation7 + $0x58] sm:$0xff]  ;;  %v469_v38 = vld [vmem:[#allocation7 + $0x1d0] sm:$0xff] }
  0x6f   : > { %1822 = vmatpush3.bf16.msra.mxu1 %v1821_v14  ;;  %1794 = vmatpush3.bf16.msra.mxu0 %v1793_v17  ;;  %v470_v39 = vld [vmem:[#allocation7 + $0x1d8] sm:$0xff]  ;;  %v355_v40 = vld [vmem:[#allocation7 + $0xe0] sm:$0xff]  ;;  %v356_v41 = vld [vmem:[#allocation7 + $0xe8] sm:$0xff]  ;;  %v1829_v42 = vpack.c.bf16 %v452_v35, %v451_v34  ;;  %v1801_v43 = vpack.c.bf16 %v338_v37, %v337_v32  ;;  %v246_v14 = vshrl.u32 %v245_v26, 7 }
  0x70   : > { %1824 = vmatprep.subr.bf16.mxu1 %v1823_v18  ;;  %1796 = vmatprep.subr.bf16.mxu0 %v1795_v21  ;;  %v339_v44 = vld [vmem:[#allocation7 + $0x60] sm:$0xff]  ;;  %v1831_v45 = vpack.c.bf16 %v470_v39, %v469_v38  ;;  %v453_v46 = vld [vmem:[#allocation7 + $0x150] sm:$0xff]  ;;  %v454_v47 = vld [vmem:[#allocation7 + $0x158] sm:$0xff]  ;;  %v1803_v48 = vpack.c.bf16 %v356_v41, %v355_v40 }
  0x71   : > { %v340_v49 = vld [vmem:[#allocation7 + $0x68] sm:$0xff]  ;;  %v471_v50 = vld [vmem:[#allocation7 + $0x1e0] sm:$0xff]  ;;  %v357_v52 = vld [vmem:[#allocation7 + $0xf0] sm:$0xff]  ;;  %v1833_v54 = vpack.c.bf16 %v454_v47, %v453_v46  ;;  %vm308_vm3 = vcmp.lt.s32.totalorder %v246_v14, 3 }
  0x72   : > { %291 = vrot.lane.b32.xlu0 %v274_v1, %s2243_s18  ;;  %v472_v51 = vld [vmem:[#allocation7 + $0x1e8] sm:$0xff]  ;;  %v358_v53 = vld [vmem:[#allocation7 + $0xf8] sm:$0xff]  ;;  %v1805_v55 = vpack.c.bf16 %v340_v49, %v339_v44  ;;  %v341_v56 = vld [vmem:[#allocation7 + $0x70] sm:$0xff] }
  0x73   : > { %1826 = vmatpush3.bf16.msra.mxu1 %v1825_v29  ;;  %1798 = vmatpush3.bf16.msra.mxu0 %v1797_v30  ;;  %v1835_v57 = vpack.c.bf16 %v472_v51, %v471_v50  ;;  %v455_v58 = vld [vmem:[#allocation7 + $0x160] sm:$0xff]  ;;  %v456_v59 = vld [vmem:[#allocation7 + $0x168] sm:$0xff]  ;;  %v1807_v60 = vpack.c.bf16 %v358_v53, %v357_v52  ;;  %v342_v61 = vld [vmem:[#allocation7 + $0x78] sm:$0xff] }
  0x74   : > { %1828 = vmatprep.subr.bf16.mxu1 %v1827_v33  ;;  %1800 = vmatprep.subr.bf16.mxu0 %v1799_v36  ;;  %v473_v62 = vld [vmem:[#allocation7 + $0x1f0] sm:$0xff]  ;;  %v474_v63 = vld [vmem:[#allocation7 + $0x1f8] sm:$0xff]  ;;  %v594_v0 = vld [vmem:[#allocation7 + $0x280] sm:$0xff]  ;;  %v1837_v2 = vpack.c.bf16 %v456_v59, %v455_v58  ;;  %v1809_v3 = vpack.c.bf16 %v342_v61, %v341_v56 }
  0x75   : > { %v595_v1 = vld [vmem:[#allocation7 + $0x288] sm:$0xff]  ;;  %v1839_v4 = vpack.c.bf16 %v474_v63, %v473_v62  ;;  %v457_v5 = vld [vmem:[#allocation7 + $0x170] sm:$0xff]  ;;  %v458_v6 = vld [vmem:[#allocation7 + $0x178] sm:$0xff] }
  0x76   : > { %v1843_v7 = vpack.c.bf16 %v595_v1, %v594_v0  ;;  %v727_v8 = vld [vmem:[#allocation7 + $0x380] sm:$0xff]  ;;  %v728_v9 = vld [vmem:[#allocation7 + $0x388] sm:$0xff]  ;;  %v1841_v10 = vpack.c.bf16 %v458_v6, %v457_v5  ;;  %v596_v24 = vld [vmem:[#allocation7 + $0x290] sm:$0xff] }
  0x77   : > { %1830 = vmatpush3.bf16.msra.mxu1 %v1829_v42  ;;  %1802 = vmatpush3.bf16.msra.mxu0 %v1801_v43  ;;  %v1875_v11 = vpack.c.bf16 %v728_v9, %v727_v8  ;;  %v578_v19 = vld [vmem:[#allocation7 + $0x200] sm:$0xff]  ;;  %v579_v20 = vld [vmem:[#allocation7 + $0x208] sm:$0xff]  ;;  %v597_v26 = vld [vmem:[#allocation7 + $0x298] sm:$0xff] }
  0x78   : > { %1832 = vmatprep.subr.bf16.mxu1 %v1831_v45  ;;  %1804 = vmatprep.subr.bf16.mxu0 %v1803_v48  ;;  %v1845_v30 = vpack.c.bf16 %v579_v20, %v578_v19  ;;  %v1847_v34 = vpack.c.bf16 %v597_v26, %v596_v24  ;;  %v580_v35 = vld [vmem:[#allocation7 + $0x210] sm:$0xff]  ;;  %v581_v36 = vld [vmem:[#allocation7 + $0x218] sm:$0xff]  ;;  %v598_v38 = vld [vmem:[#allocation7 + $0x2a0] sm:$0xff] }
  0x79   : > { %v599_v39 = vld [vmem:[#allocation7 + $0x2a8] sm:$0xff]  ;;  %v1849_v44 = vpack.c.bf16 %v581_v36, %v580_v35  ;;  %v582_v46 = vld [vmem:[#allocation7 + $0x220] sm:$0xff]  ;;  %v600_v31 = vld [vmem:[#allocation7 + $0x2b0] sm:$0xff] }
  0x7a   : > { %v1851_v45 = vpack.c.bf16 %v599_v39, %v598_v38  ;;  %v583_v47 = vld [vmem:[#allocation7 + $0x228] sm:$0xff]  ;;  %v601_v52 = vld [vmem:[#allocation7 + $0x2b8] sm:$0xff]  ;;  %v711_v53 = vld [vmem:[#allocation7 + $0x300] sm:$0xff] }
  0x7b   : > { %1834 = vmatpush3.bf16.msra.mxu1 %v1833_v54  ;;  %1806 = vmatpush3.bf16.msra.mxu0 %v1805_v55  ;;  %v712_v54 = vld [vmem:[#allocation7 + $0x308] sm:$0xff]  ;;  %v729_v55 = vld [vmem:[#allocation7 + $0x390] sm:$0xff]  ;;  %v1853_v58 = vpack.c.bf16 %v583_v47, %v582_v46  ;;  %v730_v59 = vld [vmem:[#allocation7 + $0x398] sm:$0xff]  ;;  %v1855_v1 = vpack.c.bf16 %v601_v52, %v600_v31 }
  0x7c   : > { %1836 = vmatprep.subr.bf16.mxu1 %v1835_v57  ;;  %1808 = vmatprep.subr.bf16.mxu0 %v1807_v60  ;;  %v584_v60 = vld [vmem:[#allocation7 + $0x230] sm:$0xff]  ;;  %v585_v61 = vld [vmem:[#allocation7 + $0x238] sm:$0xff]  ;;  %v602_v6 = vld [vmem:[#allocation7 + $0x2c0] sm:$0xff]  ;;  %v1877_v8 = vpack.c.bf16 %v712_v54, %v711_v53  ;;  %v1879_v9 = vpack.c.bf16 %v730_v59, %v729_v55 }
  0x7d   : > { %v713_v14 = vld [vmem:[#allocation7 + $0x310] sm:$0xff]  ;;  %v732_v19 = vld [vmem:[#allocation7 + $0x3a8] sm:$0xff]  ;;  %v586_v20 = vld [vmem:[#allocation7 + $0x240] sm:$0xff] }
  0x7e   : > { %v715_v36 = vld [vmem:[#allocation7 + $0x320] sm:$0xff]  ;;  %v733_v38 = vld [vmem:[#allocation7 + $0x3b0] sm:$0xff]  ;;  %v718_v31 = vld [vmem:[#allocation7 + $0x338] sm:$0xff] }
  0x7f   : > { %1838 = vmatpush3.bf16.msra.mxu1 %v1837_v2  ;;  %1810 = vmatpush3.bf16.msra.mxu0 %v1809_v3  ;;  %v735_v52 = vld [vmem:[#allocation7 + $0x3c0] sm:$0xff]  ;;  %v736_v54 = vld [vmem:[#allocation7 + $0x3c8] sm:$0xff]  ;;  %v609_v59 = vld [vmem:[#allocation7 + $0x2f8] sm:$0xff] }
  0x80   : > { %1840 = vmatprep.subr.bf16.mxu1 %v1839_v4  ;;  %1844 = vmatprep.subr.bf16.mxu0 %v1843_v7  ;;  %v603_v7 = vld [vmem:[#allocation7 + $0x2c8] sm:$0xff]  ;;  %v590_v55 = vld [vmem:[#allocation7 + $0x260] sm:$0xff] }
  0x83   : > { %1842 = vmatpush3.bf16.msra.mxu1 %v1841_v10 }
  0x84   : > { %1876 = vmatprep.subr.bf16.mxu1 %v1875_v11 }
  0xd2   : > { %v288_v12 = vpop.permute.xlu1 %287 }
  0xdc   : > { %v290_v13 = vpop.permute.xlu1 %289  ;;  %v284_v15 = vpop.permute.xlu0 %283 }
  0xdd   : > { %v296_v16 = vsel %vm295_vm2, %v284_v15, %v290_v13  ;;  %v299_v17 = vsel %vm295_vm2, %v290_v13, %v284_v15  ;;  %v1857_v13 = vpack.c.bf16 %v585_v61, %v584_v60  ;;  %v714_v15 = vld [vmem:[#allocation7 + $0x318] sm:$0xff]  ;;  %v1891_v61 = vpack.c.bf16 %v736_v54, %v735_v52  ;;  %v993_v52 = vld [vmem:[#allocation7 + $0x580] sm:$0xff] }
  0xde   : > { %v302_v25 = vrot.slane %v299_v17, 5  ;;  %v303_v27 = vrot.slane %v296_v16, 5  ;;  %v1859_v17 = vpack.c.bf16 %v603_v7, %v602_v6  ;;  %v860_v6 = vld [vmem:[#allocation7 + $0x480] sm:$0xff]  ;;  %v861_v7 = vld [vmem:[#allocation7 + $0x488] sm:$0xff] }
  0xe0   : > { %v294_v18 = vpop.permute.xlu1 %293  ;;  %v286_v23 = vpop.permute.xlu0 %285 }
  0xe1   : > { %v298_v21 = vsel %vm295_vm2, %v288_v12, %v294_v18  ;;  %v301_v22 = vsel %vm295_vm2, %v294_v18, %v288_v12  ;;  %v731_v18 = vld [vmem:[#allocation7 + $0x3a0] sm:$0xff] }
  0xe2   : > { %v306_v28 = vrot.slane %v301_v22, 5  ;;  %v307_v29 = vrot.slane %v298_v21, 5 }
  0xe4   : > { %v313_v32 = vsel %vm308_vm3, %v306_v28, %v302_v25  ;;  %v314_v33 = vsel %vm308_vm3, %v307_v29, %v303_v27  ;;  %v292_v37 = vpop.permute.xlu0 %291 }
  0xe5   : > { %315 = vst [vmem:[#allocation2] sm:$0xff] %v313_v32  ;;  %316 = vst [vmem:[#allocation2 + $0x8] sm:$0xff] %v314_v33  ;;  %423 = vmatprep.mubr.f32.mxu0 %v314_v33  ;;  %v297_v40 = vsel %vm295_vm2, %v286_v23, %v292_v37  ;;  %v300_v41 = vsel %vm295_vm2, %v292_v37, %v286_v23  ;;  %v587_v23 = vld [vmem:[#allocation7 + $0x248] sm:$0xff] }
  0xe6   : > { %424 = vmatmul.mubr.f32.vlgmr.msra.gmra.mrb[0].mxu0 %v313_v32  ;;  %v304_v42 = vrot.slane %v300_v41, 5  ;;  %v305_v43 = vrot.slane %v297_v40, 5  ;;  %v1861_v35 = vpack.c.bf16 %v587_v23, %v586_v20  ;;  %v716_v37 = vld [vmem:[#allocation7 + $0x328] sm:$0xff]  ;;  %v734_v40 = vld [vmem:[#allocation7 + $0x3b8] sm:$0xff]  ;;  %v588_v41 = vld [vmem:[#allocation7 + $0x250] sm:$0xff] }
  0xe7   : > { %1846 = vmatpush3.bf16.msra.mxu0 %v1845_v30  ;;  %v1883_v30 = vpack.c.bf16 %v732_v19, %v731_v18  ;;  %v1885_v46 = vpack.c.bf16 %v716_v37, %v715_v36  ;;  %v1887_v47 = vpack.c.bf16 %v734_v40, %v733_v38  ;;  %v844_v19 = vld [vmem:[#allocation7 + $0x400] sm:$0xff]  ;;  %v845_v20 = vld [vmem:[#allocation7 + $0x408] sm:$0xff]  ;;  %v847_v40 = vld [vmem:[#allocation7 + $0x418] sm:$0xff] }
  0xe8   : > { %1848 = vmatprep.subr.bf16.mxu0 %v1847_v34  ;;  %v309_v48 = vsel %vm308_vm3, %v304_v42, %v306_v28  ;;  %v310_v49 = vsel %vm308_vm3, %v305_v43, %v307_v29  ;;  %v2449_v50 = vsel %vm308_vm3, %v302_v25, %v304_v42  ;;  %v2452_v51 = vsel %vm308_vm3, %v303_v27, %v305_v43  ;;  %v604_v27 = vld [vmem:[#allocation7 + $0x2d0] sm:$0xff]  ;;  %v605_v28 = vld [vmem:[#allocation7 + $0x2d8] sm:$0xff] }
  0xe9   : > { %317 = vst [vmem:[#allocation2 + $0x10] sm:$0xff] %v2449_v50  ;;  %318 = vst [vmem:[#allocation2 + $0x18] sm:$0xff] %v2452_v51  ;;  %428 = vmatprep.mubr.f32.mxu0 %v2452_v51  ;;  %v486_v56 = vrot.slane %v2452_v51, 1  ;;  %v619_v57 = vrot.slane %v2452_v51, 2  ;;  %v483_v5 = vrot.slane %v2449_v50, 1  ;;  %v1881_v29 = vpack.c.bf16 %v714_v15, %v713_v14  ;;  %v589_v42 = vld [vmem:[#allocation7 + $0x258] sm:$0xff] }
  0xea   : > { %319 = vst [vmem:[#allocation2 + $0x20] sm:$0xff] %v309_v48  ;;  %320 = vst [vmem:[#allocation2 + $0x28] sm:$0xff] %v310_v49  ;;  %429 = vmatmul.mubr.f32.gmra.mrb[2].mxu0 %v2449_v50  ;;  %v752_v34 = vrot.slane %v2452_v51, 3  ;;  %v1863_v39 = vpack.c.bf16 %v605_v28, %v604_v27  ;;  %v1865_v48 = vpack.c.bf16 %v589_v42, %v588_v41  ;;  %v717_v49 = vld [vmem:[#allocation7 + $0x330] sm:$0xff]  ;;  %v739_v15 = vld [vmem:[#allocation7 + $0x3e0] sm:$0xff] }
  0xeb   : > { %1850 = vmatpush3.bf16.msra.mxu0 %v1849_v44  ;;  %v606_v44 = vld [vmem:[#allocation7 + $0x2e0] sm:$0xff]  ;;  %v1889_v60 = vpack.c.bf16 %v718_v31, %v717_v49  ;;  %v885_v31 = vrot.slane %v2452_v51, 4 }
  0xec   : > { %v437_v62 = vld [vmem:[#allocation2 + $0x8] sm:$0xfe]  ;;  %1852 = vmatprep.subr.bf16.mxu0 %v1851_v45  ;;  %v436_v0 = vld [vmem:[#allocation2] sm:$0xfe]  ;;  %v607_v45 = vld [vmem:[#allocation7 + $0x2e8] sm:$0xff] }
  0xed   : > { %v574_v63 = vld [vmem:[#allocation2 + $0x8] sm:$0xfc]  ;;  %v485_v2 = vrot.slane %v437_v62, 1  ;;  %v482_v4 = vrot.slane %v436_v0, 1  ;;  %v1867_v53 = vpack.c.bf16 %v607_v45, %v606_v44  ;;  %v720_v0 = vld [vmem:[#allocation7 + $0x348] sm:$0xff]  ;;  %v723_v28 = vld [vmem:[#allocation7 + $0x360] sm:$0xff] }
  0xee   : > { %v618_v3 = vrot.slane %v574_v63, 2  ;;  %v707_v16 = vld [vmem:[#allocation2 + $0x8] sm:$0xf8]  ;;  %v719_v63 = vld [vmem:[#allocation7 + $0x340] sm:$0xff]  ;;  %v865_v45 = vld [vmem:[#allocation7 + $0x4a8] sm:$0xff] }
  0xef   : > { %v487_v10 = vsel %vm481_vm4, %v485_v2, %v486_v56  ;;  %v484_v12 = vsel %vm481_vm4, %v482_v4, %v483_v5  ;;  %1854 = vmatpush3.bf16.msra.mxu0 %v1853_v58  ;;  %v751_v25 = vrot.slane %v707_v16, 3  ;;  %v608_v58 = vld [vmem:[#allocation7 + $0x2f0] sm:$0xff]  ;;  %v740_v16 = vld [vmem:[#allocation7 + $0x3e8] sm:$0xff]  ;;  %v864_v44 = vld [vmem:[#allocation7 + $0x4a0] sm:$0xff] }
  0xf0   : > { %v620_v11 = vsel %vm614_vm5, %v618_v3, %v619_v57  ;;  %560 = vmatprep.mubr.f32.mxu1 %v487_v10  ;;  %1856 = vmatprep.subr.bf16.mxu0 %v1855_v1  ;;  %v737_v1 = vld [vmem:[#allocation7 + $0x3d0] sm:$0xff]  ;;  %v1871_v2 = vpack.c.bf16 %v609_v59, %v608_v58  ;;  %v738_v3 = vld [vmem:[#allocation7 + $0x3d8] sm:$0xff]  ;;  %v1899_v27 = vpack.c.bf16 %v740_v16, %v739_v15  ;;  %v849_v58 = vld [vmem:[#allocation7 + $0x428] sm:$0xff] }
  0xf1   : > { %693 = vmatprep.mubr.f32.mxu0 %v620_v11  ;;  %561 = vmatmul.mubr.f32.vlgmr.msra.gmra.mrb[0].mxu1 %v484_v12  ;;  %v441_v21 = vld [vmem:[#allocation2 + $0x28] sm:$0x1]  ;;  %v440_v22 = vld [vmem:[#allocation2 + $0x20] sm:$0x1]  ;;  %v753_v43 = vsel %vm747_vm6, %v751_v25, %v752_v34  ;;  %v1895_v10 = vpack.c.bf16 %v738_v3, %v737_v1  ;;  %v616_v25 = vrot.slane %v2449_v50, 2  ;;  %v977_v1 = vld [vmem:[#allocation7 + $0x500] sm:$0xff] }
  0xf2   : > { %1878 = vmatpush3.bf16.msra.mxu1 %v1877_v8  ;;  %v490_v24 = vrot.slane %v441_v21, 1  ;;  %v488_v26 = vrot.slane %v440_v22, 1  ;;  %v592_v4 = vld [vmem:[#allocation7 + $0x270] sm:$0xff]  ;;  %v1893_v8 = vpack.c.bf16 %v720_v0, %v719_v63  ;;  %v576_v14 = vld [vmem:[#allocation2 + $0x28] sm:$0x3]  ;;  %v868_v15 = vld [vmem:[#allocation7 + $0x4c0] sm:$0xff] }
  0xf3   : > { %1880 = vmatprep.subr.bf16.mxu1 %v1879_v9  ;;  %1858 = vmatpush3.bf16.msra.mxu0 %v1857_v13  ;;  %v573_v9 = vld [vmem:[#allocation2] sm:$0xfc]  ;;  %v722_v13 = vld [vmem:[#allocation7 + $0x358] sm:$0xff]  ;;  %v623_v22 = vrot.slane %v576_v14, 2  ;;  %v575_v23 = vld [vmem:[#allocation2 + $0x20] sm:$0x3] }
  0xf4   : > { %v491_v32 = vsel %vm481_vm4, %v486_v56, %v490_v24  ;;  %v489_v33 = vsel %vm481_vm4, %v483_v5, %v488_v26  ;;  %1860 = vmatprep.subr.bf16.mxu0 %v1859_v17  ;;  %v591_v56 = vld [vmem:[#allocation7 + $0x268] sm:$0xff]  ;;  %v593_v5 = vld [vmem:[#allocation7 + $0x278] sm:$0xff]  ;;  %v721_v12 = vld [vmem:[#allocation7 + $0x350] sm:$0xff]  ;;  %v1907_v17 = vpack.c.bf16 %v861_v7, %v860_v6  ;;  %v615_v18 = vrot.slane %v573_v9, 2 }
  0xf5   : > { %565 = vmatprep.mubr.f32.mxu1 %v491_v32  ;;  %v1869_v62 = vpack.c.bf16 %v591_v56, %v590_v55  ;;  %v1873_v11 = vpack.c.bf16 %v593_v5, %v592_v4  ;;  %v1897_v21 = vpack.c.bf16 %v722_v13, %v721_v12  ;;  %v862_v24 = vld [vmem:[#allocation7 + $0x490] sm:$0xff]  ;;  %v863_v26 = vld [vmem:[#allocation7 + $0x498] sm:$0xff]  ;;  %v1909_v32 = vpack.c.bf16 %v845_v20, %v844_v19  ;;  %v848_v56 = vld [vmem:[#allocation7 + $0x420] sm:$0xff] }
  0xf6   : > { %566 = vmatmul.mubr.f32.gmra.mrb[2].mxu1 %v489_v33  ;;  %v741_v33 = vld [vmem:[#allocation7 + $0x3f0] sm:$0xff]  ;;  %v617_v36 = vsel %vm614_vm5, %v615_v18, %v616_v25  ;;  %v621_v37 = vrot.slane %v575_v23, 2  ;;  %v1911_v38 = vpack.c.bf16 %v863_v26, %v862_v24  ;;  %v624_v41 = vsel %vm614_vm5, %v619_v57, %v623_v22  ;;  %v867_v63 = vld [vmem:[#allocation7 + $0x4b8] sm:$0xff]  ;;  %v869_v16 = vld [vmem:[#allocation7 + $0x4c8] sm:$0xff] }
  0xf7   : > { %1882 = vmatpush3.bf16.msra.mxu1 %v1881_v29  ;;  %826 = vmatprep.mubr.f32.mxu1 %v753_v43  ;;  %v724_v29 = vld [vmem:[#allocation7 + $0x368] sm:$0xff]  ;;  %v706_v57 = vld [vmem:[#allocation2] sm:$0xf8]  ;;  %v1915_v55 = vpack.c.bf16 %v865_v45, %v864_v44  ;;  %v1917_v4 = vpack.c.bf16 %v849_v58, %v848_v56  ;;  %v996_v6 = vld [vmem:[#allocation7 + $0x598] sm:$0xff]  ;;  %v749_v12 = vrot.slane %v2449_v50, 3 }
  0xf8   : > { %1884 = vmatprep.subr.bf16.mxu1 %v1883_v30  ;;  %1862 = vmatpush3.bf16.msra.mxu0 %v1861_v35  ;;  %v840_v30 = vld [vmem:[#allocation2 + $0x8] sm:$0xf0]  ;;  %v1901_v42 = vpack.c.bf16 %v724_v29, %v723_v28  ;;  %v622_v54 = vsel %vm614_vm5, %v616_v25, %v621_v37  ;;  %v748_v3 = vrot.slane %v706_v57, 3  ;;  %v995_v5 = vld [vmem:[#allocation7 + $0x590] sm:$0xff]  ;;  %v997_v23 = vld [vmem:[#allocation7 + $0x5a0] sm:$0xff] }
  0xf9   : > { %1864 = vmatprep.subr.bf16.mxu0 %v1863_v39  ;;  %v742_v35 = vld [vmem:[#allocation7 + $0x3f8] sm:$0xff]  ;;  %v846_v39 = vld [vmem:[#allocation7 + $0x410] sm:$0xff]  ;;  %v884_v43 = vrot.slane %v840_v30, 4  ;;  %v998_v24 = vld [vmem:[#allocation7 + $0x5a8] sm:$0xff] }
  0xfa   : > { %v1913_v49 = vpack.c.bf16 %v847_v40, %v846_v39  ;;  %v973_v14 = vld [vmem:[#allocation2 + $0x8] sm:$0xe0]  ;;  %v979_v18 = vld [vmem:[#allocation7 + $0x510] sm:$0xff]  ;;  %v750_v20 = vsel %vm747_vm6, %v748_v3, %v749_v12  ;;  %v852_v28 = vld [vmem:[#allocation7 + $0x440] sm:$0xff] }
  0xfb   : > { %1886 = vmatpush3.bf16.msra.mxu1 %v1885_v46  ;;  %v1903_v46 = vpack.c.bf16 %v742_v35, %v741_v33  ;;  %v980_v19 = vld [vmem:[#allocation7 + $0x518] sm:$0xff]  ;;  %v1017_v25 = vrot.slane %v973_v14, 5  ;;  %v853_v29 = vld [vmem:[#allocation7 + $0x448] sm:$0xff]  ;;  %v1018_v35 = vrot.slane %v2452_v51, 5  ;;  %v981_v37 = vld [vmem:[#allocation7 + $0x520] sm:$0xff] }
  0xfc   : > { %1888 = vmatprep.subr.bf16.mxu1 %v1887_v47  ;;  %1866 = vmatpush3.bf16.msra.mxu0 %v1865_v48  ;;  %v725_v47 = vld [vmem:[#allocation7 + $0x370] sm:$0xff]  ;;  %v726_v48 = vld [vmem:[#allocation7 + $0x378] sm:$0xff]  ;;  %v1945_v30 = vpack.c.bf16 %v980_v19, %v979_v18  ;;  %v1001_v57 = vld [vmem:[#allocation7 + $0x5c0] sm:$0xff] }
  0xfd   : > { %1868 = vmatprep.subr.bf16.mxu0 %v1867_v53  ;;  %v994_v53 = vld [vmem:[#allocation7 + $0x588] sm:$0xff]  ;;  %v1905_v59 = vpack.c.bf16 %v726_v48, %v725_v47  ;;  %v871_v33 = vld [vmem:[#allocation7 + $0x4d8] sm:$0xff]  ;;  %v999_v40 = vld [vmem:[#allocation7 + $0x5b0] sm:$0xff] }
  0xfe   : > { %v1939_v0 = vpack.c.bf16 %v994_v53, %v993_v52  ;;  %v854_v44 = vld [vmem:[#allocation7 + $0x450] sm:$0xff]  ;;  %v855_v45 = vld [vmem:[#allocation7 + $0x458] sm:$0xff]  ;;  %v872_v47 = vld [vmem:[#allocation7 + $0x4e0] sm:$0xff] }
  0xff   : > { %1890 = vmatpush3.bf16.msra.mxu1 %v1889_v60  ;;  %v886_v60 = vsel %vm880_vm7, %v884_v43, %v885_v31  ;;  %v873_v48 = vld [vmem:[#allocation7 + $0x4e8] sm:$0xff]  ;;  %v983_v52 = vld [vmem:[#allocation7 + $0x530] sm:$0xff]  ;;  %v984_v53 = vld [vmem:[#allocation7 + $0x538] sm:$0xff] }
 0x100   : > { %1892 = vmatprep.subr.bf16.mxu1 %v1891_v61  ;;  %1870 = vmatpush3.bf16.msra.mxu0 %v1869_v62  ;;  %v709_v61 = vld [vmem:[#allocation2 + $0x28] sm:$0x7]  ;;  %v866_v62 = vld [vmem:[#allocation7 + $0x4b0] sm:$0xff]  ;;  %v1931_v56 = vpack.c.bf16 %v873_v48, %v872_v47  ;;  %v856_v58 = vld [vmem:[#allocation7 + $0x460] sm:$0xff] }
 0x101   : > { %1872 = vmatprep.subr.bf16.mxu0 %v1871_v2  ;;  %v978_v2 = vld [vmem:[#allocation7 + $0x508] sm:$0xff]  ;;  %v756_v7 = vrot.slane %v709_v61, 3  ;;  %v1919_v9 = vpack.c.bf16 %v867_v63, %v866_v62  ;;  %v874_v61 = vld [vmem:[#allocation7 + $0x4f0] sm:$0xff]  ;;  %v875_v62 = vld [vmem:[#allocation7 + $0x4f8] sm:$0xff] }
 0x102   : > { %v1941_v13 = vpack.c.bf16 %v978_v2, %v977_v1  ;;  %v986_v1 = vld [vmem:[#allocation7 + $0x548] sm:$0xff]  ;;  %v1003_v3 = vld [vmem:[#allocation7 + $0x5d0] sm:$0xff]  ;;  %v842_v18 = vld [vmem:[#allocation2 + $0x28] sm:$0xf] }
 0x103   : > { %1894 = vmatpush3.bf16.msra.mxu1 %v1893_v8  ;;  %v708_v8 = vld [vmem:[#allocation2 + $0x20] sm:$0x7]  ;;  %v757_v26 = vsel %vm747_vm6, %v752_v34, %v756_v7  ;;  %v1925_v34 = vpack.c.bf16 %v853_v29, %v852_v28  ;;  %v859_v7 = vld [vmem:[#allocation7 + $0x478] sm:$0xff]  ;;  %v839_v14 = vld [vmem:[#allocation2] sm:$0xf0] }
 0x104   : > { %1896 = vmatprep.subr.bf16.mxu1 %v1895_v10  ;;  %1874 = vmatpush3.bf16.msra.mxu0 %v1873_v11  ;;  %v850_v10 = vld [vmem:[#allocation7 + $0x430] sm:$0xff]  ;;  %v851_v11 = vld [vmem:[#allocation7 + $0x438] sm:$0xff]  ;;  %v989_v28 = vld [vmem:[#allocation7 + $0x560] sm:$0xff] }
 0x105   : > { %1908 = vmatprep.subr.bf16.mxu0 %v1907_v17  ;;  %v1943_v17 = vpack.c.bf16 %v996_v6, %v995_v5  ;;  %v1921_v22 = vpack.c.bf16 %v851_v11, %v850_v10  ;;  %v1935_v5 = vpack.c.bf16 %v875_v62, %v874_v61  ;;  %v858_v6 = vld [vmem:[#allocation7 + $0x470] sm:$0xff]  ;;  %v1127_v10 = vld [vmem:[#allocation7 + $0x688] sm:$0xff]  ;;  %v975_v62 = vld [vmem:[#allocation2 + $0x28] sm:$0x1f] }
 0x106   : > { %v990_v29 = vld [vmem:[#allocation7 + $0x568] sm:$0xff]  ;;  %v991_v48 = vld [vmem:[#allocation7 + $0x570] sm:$0xff] }
 0x107   : > { %1898 = vmatpush3.bf16.msra.mxu1 %v1897_v21  ;;  %694 = vmatmul.mubr.f32.vlgmr.msra.gmra.mrb[4].mxu0 %v617_v36  ;;  %v754_v21 = vrot.slane %v708_v8, 3  ;;  %v1947_v36 = vpack.c.bf16 %v998_v24, %v997_v23  ;;  %v881_v23 = vrot.slane %v839_v14, 4  ;;  %v1128_v24 = vld [vmem:[#allocation7 + $0x690] sm:$0xff]  ;;  %v1015_v14 = vrot.slane %v2449_v50, 5 }
 0x108   : > { %1900 = vmatprep.subr.bf16.mxu1 %v1899_v27  ;;  %698 = vmatprep.mubr.f32.mxu0 %v624_v41  ;;  %v1923_v27 = vpack.c.bf16 %v869_v16, %v868_v15  ;;  %v1000_v41 = vld [vmem:[#allocation7 + $0x5b8] sm:$0xff]  ;;  %v1937_v15 = vpack.c.bf16 %v859_v7, %v858_v6  ;;  %v1005_v16 = vld [vmem:[#allocation7 + $0x5e0] sm:$0xff]  ;;  %v1261_v7 = vld [vmem:[#allocation7 + $0x790] sm:$0xff] }
 0x109   : > { %1910 = vmatpush3.bf16.msra.mxu0 %v1909_v32  ;;  %v870_v32 = vld [vmem:[#allocation7 + $0x4d0] sm:$0xff]  ;;  %v755_v39 = vsel %vm747_vm6, %v749_v12, %v754_v21  ;;  %v1111_v21 = vld [vmem:[#allocation7 + $0x608] sm:$0xff] }
 0x10a   : > { %1912 = vmatprep.subr.bf16.mxu0 %v1911_v38  ;;  %v982_v38 = vld [vmem:[#allocation7 + $0x528] sm:$0xff]  ;;  %v1927_v43 = vpack.c.bf16 %v871_v33, %v870_v32  ;;  %v987_v12 = vld [vmem:[#allocation7 + $0x550] sm:$0xff]  ;;  %v882_v32 = vrot.slane %v2449_v50, 4 }
 0x10b   : > { %1902 = vmatpush3.bf16.msra.mxu1 %v1901_v42  ;;  %699 = vmatmul.mubr.f32.gmra.mrb[6].mxu0 %v622_v54  ;;  %v1019_v42 = vsel %vm1013_vm8, %v1017_v25, %v1018_v35  ;;  %v1929_v54 = vpack.c.bf16 %v855_v45, %v854_v44  ;;  %v1130_v44 = vld [vmem:[#allocation7 + $0x6a0] sm:$0xff]  ;;  %v1131_v45 = vld [vmem:[#allocation7 + $0x6a8] sm:$0xff] }
 0x10c   : > { %1904 = vmatprep.subr.bf16.mxu1 %v1903_v46  ;;  %959 = vmatprep.mubr.f32.mxu0 %v886_v60  ;;  %v1949_v46 = vpack.c.bf16 %v982_v38, %v981_v37  ;;  %v1953_v60 = vpack.c.bf16 %v984_v53, %v983_v52  ;;  %v1008_v37 = vld [vmem:[#allocation7 + $0x5f8] sm:$0xff] }
 0x10d   : > { %1914 = vmatpush3.bf16.msra.mxu0 %v1913_v49  ;;  %v1951_v49 = vpack.c.bf16 %v1000_v41, %v999_v40  ;;  %v1106_v38 = vld [vmem:[#allocation2 + $0x8] sm:$0xc0]  ;;  %v883_v41 = vsel %vm880_vm7, %v881_v23, %v882_v32 }
 0x10e   : > { %1916 = vmatprep.subr.bf16.mxu0 %v1915_v55  ;;  %v1002_v55 = vld [vmem:[#allocation7 + $0x5c8] sm:$0xff]  ;;  %v1113_v40 = vld [vmem:[#allocation7 + $0x618] sm:$0xff]  ;;  %v1150_v52 = vrot.slane %v1106_v38, 6  ;;  %v1284_v38 = vrot.slane %v2452_v51, 7 }
 0x10f   : > { %1906 = vmatpush3.bf16.msra.mxu1 %v1905_v59  ;;  %v857_v59 = vld [vmem:[#allocation7 + $0x468] sm:$0xff]  ;;  %v1955_v63 = vpack.c.bf16 %v1002_v55, %v1001_v57  ;;  %v1151_v55 = vrot.slane %v2452_v51, 6 }
 0x110   : > { %1940 = vmatprep.subr.bf16.mxu1 %v1939_v0  ;;  %v985_v0 = vld [vmem:[#allocation7 + $0x540] sm:$0xff]  ;;  %v1933_v2 = vpack.c.bf16 %v857_v59, %v856_v58  ;;  %v1260_v57 = vld [vmem:[#allocation7 + $0x788] sm:$0xff]  ;;  %v1979_v58 = vpack.c.bf16 %v1131_v45, %v1130_v44 }
 0x111   : > { %1918 = vmatpush3.bf16.msra.mxu0 %v1917_v4  ;;  %v1004_v4 = vld [vmem:[#allocation7 + $0x5d8] sm:$0xff]  ;;  %v1957_v8 = vpack.c.bf16 %v986_v1, %v985_v0  ;;  %v1114_v59 = vld [vmem:[#allocation7 + $0x620] sm:$0xff]  ;;  %v1152_v1 = vsel %vm1146_vm9, %v1150_v52, %v1151_v55  ;;  %v1139_v52 = vld [vmem:[#allocation7 + $0x6e8] sm:$0xff] }
 0x112   : > { %827 = vmatmul.mubr.f32.vlgmr.msra.gmra.mrb[4].mxu1 %v750_v20  ;;  %1920 = vmatprep.subr.bf16.mxu0 %v1919_v9  ;;  %v1126_v9 = vld [vmem:[#allocation7 + $0x680] sm:$0xff]  ;;  %v1959_v11 = vpack.c.bf16 %v1004_v4, %v1003_v3  ;;  %v1133_v0 = vld [vmem:[#allocation7 + $0x6b8] sm:$0xff]  ;;  %v1244_v4 = vld [vmem:[#allocation7 + $0x708] sm:$0xff] }
 0x113   : > { %831 = vmatprep.mubr.f32.mxu1 %v757_v26  ;;  %1942 = vmatpush3.bf16.msra.mxu1 %v1941_v13  ;;  %v988_v13 = vld [vmem:[#allocation7 + $0x558] sm:$0xff]  ;;  %v1971_v19 = vpack.c.bf16 %v1127_v10, %v1126_v9  ;;  %v1110_v20 = vld [vmem:[#allocation7 + $0x600] sm:$0xff]  ;;  %v1022_v9 = vrot.slane %v975_v62, 5  ;;  %v974_v10 = vld [vmem:[#allocation2 + $0x20] sm:$0x1f] }
 0x114   : > { %1944 = vmatprep.subr.bf16.mxu1 %v1943_v17  ;;  %v1006_v17 = vld [vmem:[#allocation7 + $0x5e8] sm:$0xff]  ;;  %v1129_v26 = vld [vmem:[#allocation7 + $0x698] sm:$0xff]  ;;  %v1973_v33 = vpack.c.bf16 %v1111_v21, %v1110_v20  ;;  %v1243_v3 = vld [vmem:[#allocation7 + $0x700] sm:$0xff]  ;;  %v1020_v23 = vrot.slane %v974_v10, 5 }
 0x115   : > { %1922 = vmatpush3.bf16.msra.mxu0 %v1921_v22  ;;  %v1961_v22 = vpack.c.bf16 %v988_v13, %v987_v12  ;;  %v1963_v25 = vpack.c.bf16 %v1006_v17, %v1005_v16  ;;  %v1116_v12 = vld [vmem:[#allocation7 + $0x630] sm:$0xff]  ;;  %v1117_v13 = vld [vmem:[#allocation7 + $0x638] sm:$0xff]  ;;  %v1134_v17 = vld [vmem:[#allocation7 + $0x6c0] sm:$0xff] }
 0x116   : > { %832 = vmatmul.mubr.f32.gmra.mrb[6].mxu1 %v755_v39  ;;  %1924 = vmatprep.subr.bf16.mxu0 %v1923_v27  ;;  %v889_v27 = vrot.slane %v842_v18, 4  ;;  %v1975_v39 = vpack.c.bf16 %v1129_v26, %v1128_v24  ;;  %v1239_v16 = vld [vmem:[#allocation2 + $0x8] sm:$0x80]  ;;  %v1135_v18 = vld [vmem:[#allocation7 + $0x6c8] sm:$0xff]  ;;  %v1245_v20 = vld [vmem:[#allocation7 + $0x710] sm:$0xff]  ;;  %v1985_v24 = vpack.c.bf16 %v1117_v13, %v1116_v12 }
 0x117   : > { %1946 = vmatpush3.bf16.msra.mxu1 %v1945_v30  ;;  %1092 = vmatprep.mubr.f32.mxu1 %v1019_v42  ;;  %v841_v30 = vld [vmem:[#allocation2 + $0x20] sm:$0xf]  ;;  %v1965_v42 = vpack.c.bf16 %v990_v29, %v989_v28  ;;  %v1246_v21 = vld [vmem:[#allocation7 + $0x718] sm:$0xff]  ;;  %v1263_v26 = vld [vmem:[#allocation7 + $0x7a0] sm:$0xff]  ;;  %v1283_v28 = vrot.slane %v1239_v16, 7  ;;  %v1987_v29 = vpack.c.bf16 %v1135_v18, %v1134_v17 }
 0x118   : > { %1948 = vmatprep.subr.bf16.mxu1 %v1947_v36  ;;  %v1007_v36 = vld [vmem:[#allocation7 + $0x5f0] sm:$0xff]  ;;  %v1254_v13 = vld [vmem:[#allocation7 + $0x758] sm:$0xff]  ;;  %v1271_v16 = vld [vmem:[#allocation7 + $0x7e0] sm:$0xff] }
 0x119   : > { %1926 = vmatpush3.bf16.msra.mxu0 %v1925_v34  ;;  %v1112_v34 = vld [vmem:[#allocation7 + $0x610] sm:$0xff]  ;;  %v1967_v47 = vpack.c.bf16 %v1008_v37, %v1007_v36  ;;  %v1137_v37 = vld [vmem:[#allocation7 + $0x6d8] sm:$0xff]  ;;  %v1285_v44 = vsel %vm1279_vm10, %v1283_v28, %v1284_v38  ;;  %v1272_v17 = vld [vmem:[#allocation7 + $0x7e8] sm:$0xff] }
 0x11a   : > { %1928 = vmatprep.subr.bf16.mxu0 %v1927_v43  ;;  %v887_v43 = vrot.slane %v841_v30, 4  ;;  %v1977_v53 = vpack.c.bf16 %v1113_v40, %v1112_v34  ;;  %v1118_v30 = vld [vmem:[#allocation7 + $0x640] sm:$0xff]  ;;  %v1136_v36 = vld [vmem:[#allocation7 + $0x6d0] sm:$0xff]  ;;  %v1248_v40 = vld [vmem:[#allocation7 + $0x728] sm:$0xff] }
 0x11b   : > { %1950 = vmatpush3.bf16.msra.mxu1 %v1949_v46  ;;  %v890_v46 = vsel %vm880_vm7, %v885_v31, %v889_v27  ;;  %v1023_v27 = vsel %vm1013_vm8, %v1018_v35, %v1022_v9  ;;  %v1247_v34 = vld [vmem:[#allocation7 + $0x720] sm:$0xff]  ;;  %v1991_v45 = vpack.c.bf16 %v1137_v37, %v1136_v36  ;;  %v1125_v9 = vld [vmem:[#allocation7 + $0x678] sm:$0xff]  ;;  %v1253_v12 = vld [vmem:[#allocation7 + $0x750] sm:$0xff] }
 0x11c   : > { %1952 = vmatprep.subr.bf16.mxu1 %v1951_v49  ;;  %v992_v49 = vld [vmem:[#allocation7 + $0x578] sm:$0xff]  ;;  %v888_v31 = vsel %vm880_vm7, %v882_v32, %v887_v43  ;;  %v1119_v32 = vld [vmem:[#allocation7 + $0x648] sm:$0xff]  ;;  %v1257_v37 = vld [vmem:[#allocation7 + $0x770] sm:$0xff] }
 0x11d   : > { %1930 = vmatpush3.bf16.msra.mxu0 %v1929_v54  ;;  %v1259_v54 = vld [vmem:[#allocation7 + $0x780] sm:$0xff]  ;;  %v1969_v61 = vpack.c.bf16 %v992_v49, %v991_v48  ;;  %v1989_v35 = vpack.c.bf16 %v1119_v32, %v1118_v30  ;;  %v1266_v43 = vld [vmem:[#allocation7 + $0x7b8] sm:$0xff]  ;;  %v2013_v48 = vpack.c.bf16 %v1248_v40, %v1247_v34  ;;  %v1238_v34 = vld [vmem:[#allocation2] sm:$0x80] }
 0x11e   : > { %1932 = vmatprep.subr.bf16.mxu0 %v1931_v56  ;;  %v972_v56 = vld [vmem:[#allocation2] sm:$0xe0]  ;;  %v1138_v49 = vld [vmem:[#allocation7 + $0x6e0] sm:$0xff]  ;;  %v1108_v18 = vld [vmem:[#allocation2 + $0x28] sm:$0x3f] }
 0x11f   : > { %1954 = vmatpush3.bf16.msra.mxu1 %v1953_v60  ;;  %v1115_v60 = vld [vmem:[#allocation7 + $0x628] sm:$0xff]  ;;  %v1274_v28 = vld [vmem:[#allocation7 + $0x7f8] sm:$0xff] }
 0x120   : > { %1956 = vmatprep.subr.bf16.mxu1 %v1955_v63  ;;  %v1132_v63 = vld [vmem:[#allocation7 + $0x6b0] sm:$0xff]  ;;  %v1981_v6 = vpack.c.bf16 %v1115_v60, %v1114_v59  ;;  %v1268_v59 = vld [vmem:[#allocation7 + $0x7c8] sm:$0xff]  ;;  %v1995_v60 = vpack.c.bf16 %v1139_v52, %v1138_v49 }
 0x121   : > { %1934 = vmatpush3.bf16.msra.mxu0 %v1933_v2  ;;  %v2003_v2 = vpack.c.bf16 %v1260_v57, %v1259_v54  ;;  %v1249_v54 = vld [vmem:[#allocation7 + $0x730] sm:$0xff]  ;;  %v1250_v57 = vld [vmem:[#allocation7 + $0x738] sm:$0xff] }
 0x122   : > { %1936 = vmatprep.subr.bf16.mxu0 %v1935_v5  ;;  %v1014_v5 = vrot.slane %v972_v56, 5  ;;  %v2017_v62 = vpack.c.bf16 %v1250_v57, %v1249_v54 }
 0x123   : > { %1958 = vmatpush3.bf16.msra.mxu1 %v1957_v8  ;;  %v1262_v8 = vld [vmem:[#allocation7 + $0x798] sm:$0xff] }
 0x124   : > { %1960 = vmatprep.subr.bf16.mxu1 %v1959_v11  ;;  %v1983_v11 = vpack.c.bf16 %v1133_v0, %v1132_v63  ;;  %v1140_v63 = vld [vmem:[#allocation7 + $0x6f0] sm:$0xff]  ;;  %v1141_v0 = vld [vmem:[#allocation7 + $0x6f8] sm:$0xff] }
 0x125   : > { %1938 = vmatpush3.bf16.msra.mxu0 %v1937_v15  ;;  %v2005_v15 = vpack.c.bf16 %v1244_v4, %v1243_v3  ;;  %v1252_v3 = vld [vmem:[#allocation7 + $0x748] sm:$0xff] }
 0x126   : > { %1972 = vmatprep.subr.bf16.mxu0 %v1971_v19  ;;  %v2007_v19 = vpack.c.bf16 %v1262_v8, %v1261_v7  ;;  %v1999_v7 = vpack.c.bf16 %v1141_v0, %v1140_v63  ;;  %v1124_v8 = vld [vmem:[#allocation7 + $0x670] sm:$0xff] }
 0x127   : > { %1962 = vmatpush3.bf16.msra.mxu1 %v1961_v22  ;;  %v1016_v22 = vsel %vm1013_vm8, %v1014_v5, %v1015_v14  ;;  %v1269_v5 = vld [vmem:[#allocation7 + $0x7d0] sm:$0xff] }
 0x128   : > { %960 = vmatmul.mubr.f32.vlgmr.msra.gmra.mrb[8].mxu0 %v883_v41  ;;  %1964 = vmatprep.subr.bf16.mxu1 %v1963_v25  ;;  %v1264_v25 = vld [vmem:[#allocation7 + $0x7a8] sm:$0xff]  ;;  %v1021_v41 = vsel %vm1013_vm8, %v1015_v14, %v1020_v23  ;;  %v1105_v14 = vld [vmem:[#allocation2] sm:$0xc0]  ;;  %v1255_v23 = vld [vmem:[#allocation7 + $0x760] sm:$0xff] }
 0x129   : > { %964 = vmatprep.mubr.f32.mxu0 %v890_v46  ;;  %1974 = vmatpush3.bf16.msra.mxu0 %v1973_v33  ;;  %v2009_v33 = vpack.c.bf16 %v1246_v21, %v1245_v20  ;;  %v1120_v46 = vld [vmem:[#allocation7 + $0x650] sm:$0xff]  ;;  %v1147_v20 = vrot.slane %v1105_v14, 6  ;;  %v2027_v21 = vpack.c.bf16 %v1272_v17, %v1271_v16 }
 0x12a   : > { %1976 = vmatprep.subr.bf16.mxu0 %v1975_v39  ;;  %v2011_v39 = vpack.c.bf16 %v1264_v25, %v1263_v26  ;;  %v1107_v26 = vld [vmem:[#allocation2 + $0x20] sm:$0x3f]  ;;  %v1148_v25 = vrot.slane %v2449_v50, 6 }
 0x12b   : > { %1966 = vmatpush3.bf16.msra.mxu1 %v1965_v42  ;;  %v1265_v42 = vld [vmem:[#allocation7 + $0x7b0] sm:$0xff]  ;;  %v1153_v32 = vrot.slane %v1107_v26, 6 }
 0x12c   : > { %965 = vmatmul.mubr.f32.gmra.mrb[10].mxu0 %v888_v31  ;;  %1968 = vmatprep.subr.bf16.mxu1 %v1967_v47  ;;  %v1121_v47 = vld [vmem:[#allocation7 + $0x658] sm:$0xff]  ;;  %v1122_v31 = vld [vmem:[#allocation7 + $0x660] sm:$0xff] }
 0x12d   : > { %1978 = vmatpush3.bf16.msra.mxu0 %v1977_v53  ;;  %1225 = vmatprep.mubr.f32.mxu0 %v1152_v1  ;;  %v2015_v53 = vpack.c.bf16 %v1266_v43, %v1265_v42  ;;  %v1993_v56 = vpack.c.bf16 %v1121_v47, %v1120_v46  ;;  %v1154_v40 = vsel %vm1146_vm9, %v1148_v25, %v1153_v32  ;;  %v1280_v42 = vrot.slane %v1238_v34, 7 }
 0x12e   : > { %1980 = vmatprep.subr.bf16.mxu0 %v1979_v58  ;;  %v1267_v58 = vld [vmem:[#allocation7 + $0x7c0] sm:$0xff] }
 0x12f   : > { %1970 = vmatpush3.bf16.msra.mxu1 %v1969_v61  ;;  %v1123_v61 = vld [vmem:[#allocation7 + $0x668] sm:$0xff]  ;;  %v2019_v1 = vpack.c.bf16 %v1268_v59, %v1267_v58 }
 0x130   : > { %2004 = vmatprep.subr.bf16.mxu1 %v2003_v2  ;;  %v1251_v2 = vld [vmem:[#allocation7 + $0x740] sm:$0xff]  ;;  %v1997_v4 = vpack.c.bf16 %v1123_v61, %v1122_v31 }
 0x131   : > { %1982 = vmatpush3.bf16.msra.mxu0 %v1981_v6  ;;  %v1270_v6 = vld [vmem:[#allocation7 + $0x7d8] sm:$0xff]  ;;  %v2021_v10 = vpack.c.bf16 %v1252_v3, %v1251_v2 }
 0x132   : > { %1093 = vmatmul.mubr.f32.vlgmr.msra.gmra.mrb[8].mxu1 %v1016_v22  ;;  %1984 = vmatprep.subr.bf16.mxu0 %v1983_v11  ;;  %v2023_v11 = vpack.c.bf16 %v1270_v6, %v1269_v5  ;;  %v1155_v22 = vrot.slane %v1108_v18, 6 }
 0x133   : > { %1097 = vmatprep.mubr.f32.mxu1 %v1023_v27  ;;  %2006 = vmatpush3.bf16.msra.mxu1 %v2005_v15  ;;  %v2001_v15 = vpack.c.bf16 %v1125_v9, %v1124_v8  ;;  %v1273_v27 = vld [vmem:[#allocation7 + $0x7f0] sm:$0xff] }
 0x134   : > { %2008 = vmatprep.subr.bf16.mxu1 %v2007_v19  ;;  %v2025_v19 = vpack.c.bf16 %v1254_v13, %v1253_v12  ;;  %v2031_v36 = vpack.c.bf16 %v1274_v28, %v1273_v27 }
 0x135   : > { %1986 = vmatpush3.bf16.msra.mxu0 %v1985_v24  ;;  %v1256_v24 = vld [vmem:[#allocation7 + $0x768] sm:$0xff] }
 0x136   : > { %1098 = vmatmul.mubr.f32.gmra.mrb[10].mxu1 %v1021_v41  ;;  %1988 = vmatprep.subr.bf16.mxu0 %v1987_v29  ;;  %v1149_v29 = vsel %vm1146_vm9, %v1147_v20, %v1148_v25  ;;  %v2029_v30 = vpack.c.bf16 %v1256_v24, %v1255_v23 }
 0x137   : > { %2010 = vmatpush3.bf16.msra.mxu1 %v2009_v33  ;;  %1358 = vmatprep.mubr.f32.mxu1 %v1285_v44  ;;  %v1156_v33 = vsel %vm1146_vm9, %v1151_v55, %v1155_v22  ;;  %v1240_v44 = vld [vmem:[#allocation2 + $0x20] sm:$0x7f] }
 0x138   : > { %2012 = vmatprep.subr.bf16.mxu1 %v2011_v39  ;;  %v1258_v39 = vld [vmem:[#allocation7 + $0x778] sm:$0xff]  ;;  %v1286_v46 = vrot.slane %v1240_v44, 7 }
 0x139   : > { %1990 = vmatpush3.bf16.msra.mxu0 %v1989_v35  ;;  %v2033_v41 = vpack.c.bf16 %v1258_v39, %v1257_v37  ;;  %v1241_v35 = vld [vmem:[#allocation2 + $0x28] sm:$0x7f] }
 0x13a   : > { %1992 = vmatprep.subr.bf16.mxu0 %v1991_v45  ;;  %v1288_v43 = vrot.slane %v1241_v35, 7  ;;  %v1281_v45 = vrot.slane %v2449_v50, 7  ;;  %v322_v50 = vstv %s321_s19 }
 0x13b   : > { %2014 = vmatpush3.bf16.msra.mxu1 %v2013_v48 }
 0x13c   : > { %2016 = vmatprep.subr.bf16.mxu1 %v2015_v53  ;;  %v1282_v55 = vsel %vm1279_vm10, %v1280_v42, %v1281_v45  ;;  %v1289_v47 = vsel %vm1279_vm10, %v1284_v38, %v1288_v43  ;;  %v1287_v48 = vsel %vm1279_vm10, %v1281_v45, %v1286_v46 }
 0x13d   : > { %1994 = vmatpush3.bf16.msra.mxu0 %v1993_v56 }
 0x13e   : > { %1996 = vmatprep.subr.bf16.mxu0 %v1995_v60 }
 0x13f   : > { %2018 = vmatpush3.bf16.msra.mxu1 %v2017_v62 }
 0x140   : > { %2020 = vmatprep.subr.bf16.mxu1 %v2019_v1 }
 0x141   : > { %1998 = vmatpush3.bf16.msra.mxu0 %v1997_v4 }
 0x142   : > { %2000 = vmatprep.subr.bf16.mxu0 %v1999_v7 }
 0x143   : > { %2022 = vmatpush3.bf16.msra.mxu1 %v2021_v10 }
 0x144   : > { %2024 = vmatprep.subr.bf16.mxu1 %v2023_v11 }
 0x145   : > { %2002 = vmatpush3.bf16.msra.mxu0 %v2001_v15 }
 0x147   : > { %2026 = vmatpush3.bf16.msra.mxu1 %v2025_v19 }
 0x148   : > { %1226 = vmatmul.mubr.f32.vlgmr.msra.gmra.mrb[12].mxu0 %v1149_v29  ;;  %2028 = vmatprep.subr.bf16.mxu1 %v2027_v21 }
 0x149   : > { %1230 = vmatprep.mubr.f32.mxu0 %v1156_v33 }
 0x14b   : > { %2030 = vmatpush3.bf16.msra.mxu1 %v2029_v30 }
 0x14c   : > { %1231 = vmatmul.mubr.f32.gmra.mrb[14].mxu0 %v1154_v40  ;;  %2032 = vmatprep.subr.bf16.mxu1 %v2031_v36 }
 0x14f   : > { %2034 = vmatpush3.bf16.msra.mxu1 %v2033_v41 }
 0x152   : > { %1359 = vmatmul.mubr.f32.vlgmr.msra.gmra.mrb[12].mxu1 %v1282_v55 }
 0x153   : > { %1363 = vmatprep.mubr.f32.mxu1 %v1289_v47 }
 0x156   : > { %1364 = vmatmul.mubr.f32.gmra.mrb[14].mxu1 %v1287_v48 }
 0x1b9   : > { %v1507_v49 = vpop.f32.mrb[0].mxu0 }
 0x1ba   : > { %v1508_v52 = vpop.f32.mrb[1].mxu0 }
 0x1bb   : > { %v1509_v53 = vadd.f32 %v1508_v52, %v1507_v49 }
 0x1bd   : > { %v1510_v54 = vpop.f32.mrb[2].mxu0  ;;  %v434_v60 = vadd.f32 %v1509_v53, %v322_v50 }
 0x1be   : > { %v1511_v57 = vpop.f32.mrb[3].mxu0 }
 0x1bf   : > { %v1512_v56 = vadd.f32 %v1511_v57, %v1510_v54 }
 0x1c1   : > { %v435_v38 = vadd.f32 %v1512_v56, %v322_v50 }
 0x1c4   : > { %v1545_v58 = vpop.f32.mrb[0].mxu1 }
 0x1c5   : > { %v1546_v59 = vpop.f32.mrb[1].mxu1 }
 0x1c6   : > { %v1547_v31 = vadd.f32 %v1546_v59, %v1545_v58 }
 0x1c8   : > { %v571_v61 = vadd.f32 %v1547_v31, %v434_v60 }
 0x1c9   : > { %v1548_v51 = vpop.f32.mrb[2].mxu1 }
 0x1ca   : > { %v1549_v62 = vpop.f32.mrb[3].mxu1 }
 0x1cb   : > { %v1550_v63 = vadd.f32 %v1549_v62, %v1548_v51 }
 0x1cd   : > { %v572_v0 = vadd.f32 %v1550_v63, %v435_v38 }
 0x1da   : > { %v1583_v1 = vpop.f32.mrb[4].mxu0 }
 0x1db   : > { %v1584_v2 = vpop.f32.mrb[5].mxu0 }
 0x1dc   : > { %v1585_v3 = vadd.f32 %v1584_v2, %v1583_v1 }
 0x1de   : > { %v704_v4 = vadd.f32 %v1585_v3, %v571_v61  ;;  %v1586_v5 = vpop.f32.mrb[6].mxu0 }
 0x1df   : > { %v1587_v6 = vpop.f32.mrb[7].mxu0 }
 0x1e0   : > { %v1588_v7 = vadd.f32 %v1587_v6, %v1586_v5 }
 0x1e2   : > { %v705_v8 = vadd.f32 %v1588_v7, %v572_v0 }
 0x1e5   : > { %v1621_v9 = vpop.f32.mrb[4].mxu1 }
 0x1e6   : > { %v1622_v10 = vpop.f32.mrb[5].mxu1 }
 0x1e7   : > { %v1623_v11 = vadd.f32 %v1622_v10, %v1621_v9 }
 0x1e9   : > { %v837_v12 = vadd.f32 %v1623_v11, %v704_v4  ;;  %v1624_v13 = vpop.f32.mrb[6].mxu1 }
 0x1ea   : > { %v1625_v14 = vpop.f32.mrb[7].mxu1 }
 0x1eb   : > { %v1626_v15 = vadd.f32 %v1625_v14, %v1624_v13 }
 0x1ed   : > { %v838_v16 = vadd.f32 %v1626_v15, %v705_v8 }
 0x1fb   : > { %v1659_v17 = vpop.f32.mrb[8].mxu0 }
 0x1fc   : > { %v1660_v18 = vpop.f32.mrb[9].mxu0 }
 0x1fd   : > { %v1661_v19 = vadd.f32 %v1660_v18, %v1659_v17 }
 0x1ff   : > { %v970_v20 = vadd.f32 %v1661_v19, %v837_v12  ;;  %v1662_v21 = vpop.f32.mrb[10].mxu0 }
 0x200   : > { %v1663_v22 = vpop.f32.mrb[11].mxu0 }
 0x201   : > { %v1664_v23 = vadd.f32 %v1663_v22, %v1662_v21 }
 0x203   : > { %v971_v24 = vadd.f32 %v1664_v23, %v838_v16 }
 0x205   : > { %v1697_v26 = vpop.f32.mrb[8].mxu1 }
 0x206   : > { %v1698_v25 = vpop.f32.mrb[9].mxu1 }
 0x207   : > { %v1699_v27 = vadd.f32 %v1698_v25, %v1697_v26 }
 0x209   : > { %v1103_v28 = vadd.f32 %v1699_v27, %v970_v20  ;;  %v1700_v29 = vpop.f32.mrb[10].mxu1 }
 0x20a   : > { %v1701_v30 = vpop.f32.mrb[11].mxu1 }
 0x20b   : > { %v1702_v32 = vadd.f32 %v1701_v30, %v1700_v29 }
 0x20d   : > { %v1104_v33 = vadd.f32 %v1702_v32, %v971_v24 }
 0x21b   : > { %v1735_v36 = vpop.f32.mrb[12].mxu0 }
 0x21c   : > { %v1736_v37 = vpop.f32.mrb[13].mxu0 }
 0x21d   : > { %v1737_v39 = vadd.f32 %v1736_v37, %v1735_v36 }
 0x21f   : > { %v1236_v34 = vadd.f32 %v1737_v39, %v1103_v28  ;;  %v1738_v40 = vpop.f32.mrb[14].mxu0 }
 0x220   : > { %v1739_v41 = vpop.f32.mrb[15].mxu0 }
 0x221   : > { %v1740_v35 = vadd.f32 %v1739_v41, %v1738_v40 }
 0x223   : > { %v1237_v42 = vadd.f32 %v1740_v35, %v1104_v33 }
 0x225   : > { %v1773_v43 = vpop.f32.mrb[12].mxu1 }
 0x226   : > { %v1774_v44 = vpop.f32.mrb[13].mxu1 }
 0x227   : > { %v1775_v45 = vadd.f32 %v1774_v44, %v1773_v43 }
 0x229   : > { %v1369_v55 = vadd.f32 %v1775_v45, %v1236_v34  ;;  %v1776_v46 = vpop.f32.mrb[14].mxu1 }
 0x22a   : > { %v1777_v47 = vpop.f32.mrb[15].mxu1 }
 0x22b   : > { %v1467_v48 = vmul.f32 -1.442695, %v1369_v55  ;;  %v1778_v49 = vadd.f32 %v1777_v47, %v1776_v46 }
 0x22d   : > { %2100 = vpow2.f32 %v1467_v48  ;;  %v1370_v52 = vadd.f32 %v1778_v49, %v1237_v42 }
 0x22f   : > { %v1468_v53 = vmul.f32 -1.442695, %v1370_v52 }
 0x231   : > { %2102 = vpow2.f32 %v1468_v53 }
 0x237   : > { %v2101_v54 = vpop.eup %2100 }
 0x238   : > { %v1377_v57 = vadd.f32 1.0, %v2101_v54 }
 0x23a   : > { %2104 = vrcp.f32 %v1377_v57 }
 0x23b   : > { %v2103_v56 = vpop.eup %2102 }
 0x23c   : > { %v1378_v50 = vadd.f32 1.0, %v2103_v56 }
 0x23e   : > { %2106 = vrcp.f32 %v1378_v50 }
 0x244   : > { %v2105_v58 = vpop.eup %2104 }
 0x245   : > { %1383 = vst [vmem:[#allocation9] sm:$0xff] %v2105_v58 }
 0x248   : > { %v2107_v59 = vpop.eup %2106 }
 0x249   : > { %1384 = vst [vmem:[#allocation9 + $0x8] sm:$0xff] %v2107_v59 }
 0x24a PF: > { %p2056_p4 = scmp.eq.s32.totalorder %s2289_s2, 1  ;;  %s2244_s7 = smov [#allocation9]  }
 0x24b   : > { %s1391_s8 = sshll.u32 %s2244_s7, 4  ;;  %s1392_s8 = int_to_ptr.vmem [resolvable:$true] %s1391_s8 }
 0x24c   : > { %s2166_s22 = scalar_lea.vmem %s1392_s8, 256  ;;  %p2173_p10 = scmp.lt.s32.totalorder %s1392_s8, %s1392_s8 }
 0x24d   : > { %p2167_p5 = scmp.ne.s32.totalorder %s1392_s8, %s2166_s22  ;;  %p2174_p12 = scmp.lt.s32.totalorder %s2166_s22, %s2166_s22 }
 0x24f   : > { %p2168_p6 = pnand %p2167_p5, %p2056_p4  ;;  %p2175_p0 = por %p2174_p12, %p2173_p10 }
 0x251   : > { %p2169_p9 = pneg %p2168_p6 }
 0x253   : > { %p2176_p2 = pnand %p2175_p0, %p2169_p9 }
 0x255   : > { %2179 = shalt.err (!%p2176_p2)
}
 0x256   : > { %s2180_s24 = scalar_lea.hbm %s2563_s3, 256 }
 0x257   : > { %p2181_p11 = scmp.ne.s32.totalorder %s2563_s3, %s2180_s24  ;;  %p2186_p7 = scmp.lt.u32.totalorder %s2180_s24, %s2563_s3 }
 0x259   : > { %p2182_p13 = pnand %p2181_p11, %p2056_p4 }
 0x25b   : > { %p2183_p3 = pneg %p2182_p13 }
 0x25d   : > { %p2188_p8 = pnand %p2186_p7, %p2183_p3 }
 0x25f   : > { %2191 = shalt.err (!%p2188_p8)
}
 0x260   : > { %s2245_s30 = smov 128   ;;  %s2246_s4 = smov 8  }
 0x261   : > { %2042 = dma.vmem_to_hbm [thread:$0]  (%p2056_p4), %s1392_s8, 256, %s2563_s3, [#allocation6], %s2245_s30, %s2245_s30, %s2246_s4  }
 0x262   : > { %2217 = dma.done.wait (%p2056_p4), [#allocation6], 256  }
 0x263   : > { %2219 = vsyncadd (%p2056_p4), [#allocation6], 4294967040 }
 0x264 PF: > { %p16_p1 = scmp.ge.s32.totalorder %s2315_s23, 4   ;;  %s2576_s14 = smov %s2226_s15 }
 0x265   : > { %s2577_s15 = smov %s2230_s16  ;;  %s2578_s16 = smov %s2344_s11 }
 0x266   : > { %s2579_s17 = smov %s2315_s23  ;;  %18 = sbr.rel (!%p16_p1) target bundleno = 7 (0x7), region = 88 }
 0x26d   :  { %1407 = vsyncpa [#allocation5], 1 }
 0x26e   :  { %1409 = vsyncpa [#allocation5 + $0x1], 1 }
 0x26f   :  { %1410 = vsyncpa [#allocation8], 1 }
 0x270   :  { %1411 = vsyncpa [#allocation6], 1 }
 0x271   :  { %1413 = vsyncpa [#allocation6 + $0x1], 1 }

</bundles_post_ra>
